<compile_context>
chip_gen: v7x
topology: tpu7x:2x2x1
jax: 0.10.0
libtpu: 0.0.40
codegen_flags: <defaults>
</compile_context>

<pallas_src>
import functools

import jax
import jax.numpy as jnp
from jax.experimental import pallas as pl
from jax.experimental.pallas import tpu as pltpu

# Layer widths of the nn.Sequential in LinearNetController2.
LAYER_DIMS = [32, 64, 128, 128, 256, 256, 512]


def _controller_kernel(x_ref, *refs):
    """Fused 6x (Linear + ReLU) over one batch tile.

    refs = (w1, b1, w2, b2, ..., w6, b6, o_ref)
    Parameters use constant index_maps, so they are DMA'd once and stay
    resident in VMEM across grid steps; only the activation tile moves.
    The MXU operand dtype is taken from the weight dtype (bf16 or f32);
    accumulation, bias add and ReLU are always f32.
    """
    o_ref = refs[-1]
    param_refs = refs[:-1]

    h = x_ref[...].astype(jnp.float32)
    n_layers = len(param_refs) // 2
    for l in range(n_layers):
        w = param_refs[2 * l][...]          # (in, out), bf16 or f32
        b = param_refs[2 * l + 1][...]      # (1, out), f32
        acc = jnp.dot(h.astype(w.dtype), w, preferred_element_type=jnp.float32)
        h = jnp.maximum(acc + b, 0.0)       # bias + ReLU in f32 on the VPU
    o_ref[...] = h.astype(o_ref.dtype)


def _round_up(n: int, m: int) -> int:
    return ((n + m - 1) // m) * m


def _choose_tile_b(batch: int) -> int:
    """Pick a batch tile.

    Small B (latency regime, e.g. the B=8 controller use case): one grid step
    with everything resident -- extra grid steps are pure ~0.35 us/step loss.
    Large B (throughput regime): tiles of up to 1024 rows amortize the per-step
    overhead, while forcing >= 2 tiles so the "parallel" grid axis can be
    sharded across both v7x TensorCores.
    """
    if batch <= 256:
        return max(8, _round_up(batch, 8))
    half = (batch + 1) // 2
    return min(1024, _round_up(half, 256))


def _vmem_limit_bytes(tile_b: int, param_bytes: int):
    """Raise the scoped-VMEM limit only when needed; never ask for 64 MiB.

    Default scoped limits: 16 MiB (v5e), 32 MiB (v6e/v7x). We trigger at a
    conservative 12 MiB estimate (covers v5e) and cap the request at 48 MiB
    since v7x only has 64 MiB of physical VMEM per TensorCore.
    """
    act_bytes = 2 * 4 * tile_b * (LAYER_DIMS[0] + LAYER_DIMS[-1])  # x/out double-buffered
    interm_bytes = 4 * 4 * tile_b * max(LAYER_DIMS)                # f32 temporaries headroom
    needed = param_bytes + act_bytes + interm_bytes
    if needed <= 12 * 1024 * 1024:
        return None
    return min(48 * 1024 * 1024, max(16 * 1024 * 1024, (needed * 4) // 3))


@functools.partial(
    jax.jit, static_argnames=("tile_b", "out_dtype", "single_buffer_params")
)
def _forward(x, params, tile_b, out_dtype, single_buffer_params):
    B, d_in = x.shape
    d_out = LAYER_DIMS[-1]
    n_tiles = pl.cdiv(B, tile_b)

    # Activation/output tiles move with the grid; parameters use full-array
    # blocks pinned to block index (0, 0) -> DMA'd once, resident thereafter.
    x_spec = pl.BlockSpec((tile_b, d_in), lambda i: (i, 0))
    out_spec = pl.BlockSpec((tile_b, d_out), lambda i: (i, 0))
    if single_buffer_params:
        # Grid-invariant operands don't need double buffering.
        param_specs = [
            pl.BlockSpec(p.shape, lambda i: (0, 0), pipeline_mode=pl.Buffered(1))
            for p in params
        ]
        param_bytes = sum(int(p.size) * p.dtype.itemsize for p in params)
    else:
        param_specs = [pl.BlockSpec(p.shape, lambda i: (0, 0)) for p in params]
        param_bytes = 2 * sum(int(p.size) * p.dtype.itemsize for p in params)

    vmem_limit = _vmem_limit_bytes(tile_b, param_bytes)

    return pl.pallas_call(
        _controller_kernel,
        out_shape=jax.ShapeDtypeStruct((B, d_out), out_dtype),
        grid_spec=pltpu.PrefetchScalarGridSpec(
            num_scalar_prefetch=0,
            grid=(n_tiles,),
            in_specs=[x_spec] + param_specs,
            out_specs=out_spec,
        ),
        compiler_params=pltpu.CompilerParams(
            dimension_semantics=("parallel",),   # megacore-shardable on v7x
            vmem_limit_bytes=vmem_limit,
        ),
    )(x, *params)


def linear_net_controller2(x, params, tile_b=None, use_bf16=True,
                           out_dtype=jnp.float32):
    """Forward pass of LinearNetController2.

    x:      (B, 32) float32
    params: flat list [w1, b1, ..., w6, b6], wi: (in_i, out_i), bi: (1, out_i)
    returns (B, 512) out_dtype  (Flatten on a 2-D tensor is the identity)

    use_bf16=True (default): weights are cast once at the call boundary to
    bf16 MXU operands with f32 accumulation. use_bf16=False keeps exact f32.
    """
    B, d_in = x.shape
    assert d_in == LAYER_DIMS[0], (d_in, LAYER_DIMS[0])
    if tile_b is None:
        tile_b = _choose_tile_b(B)

    wdt = jnp.bfloat16 if use_bf16 else jnp.float32
    prepared = []
    for i, p in enumerate(params):
        target = wdt if (i % 2 == 0) else jnp.float32   # weights even, biases odd
        prepared.append(p if p.dtype == target else p.astype(target))

    try:
        return _forward(x, prepared, int(tile_b), out_dtype, True)
    except Exception:
        # Fallback if this JAX build rejects pipeline_mode=pl.Buffered(1) on
        # the grid-invariant parameter BlockSpecs (costs ~0.5-1 MiB of VMEM).
        return _forward(x, prepared, int(tile_b), out_dtype, False)


def init_params(key):
    """Synthetic init matching init_sequence(): kaiming_uniform weights (a=0,
    fan_in mode -> bound = sqrt(6/fan_in)) and zero biases.

    Weights returned pre-transposed as (in, out); biases as (1, out). All f32;
    cast weights with cast_weights(...) for the bf16 fast path.
    """
    params = []
    for l in range(len(LAYER_DIMS) - 1):
        fan_in, fan_out = LAYER_DIMS[l], LAYER_DIMS[l + 1]
        key, wk = jax.random.split(key)
        bound = jnp.sqrt(6.0 / fan_in)
        w = jax.random.uniform(
            wk, (fan_in, fan_out), dtype=jnp.float32, minval=-bound, maxval=bound
        )
        b = jnp.zeros((1, fan_out), dtype=jnp.float32)
        params += [w, b]
    return params


def cast_weights(params, dtype=jnp.bfloat16):
    """Cast the weight matrices (even indices) once; biases stay f32."""
    return [p.astype(dtype) if i % 2 == 0 else p for i, p in enumerate(params)]


def reference_forward(x, params):
    """Pure-JAX f32 reference for correctness checking."""
    h = x
    for l in range(len(params) // 2):
        w = params[2 * l].astype(jnp.float32)
        b = params[2 * l + 1].astype(jnp.float32)
        h = jnp.maximum(h @ w + b, 0.0)
    return h.reshape(h.shape[0], -1)  # Flatten (no-op here)


if __name__ == "__main__":
    key = jax.random.PRNGKey(0)
    key, xk = jax.random.split(key)
    params_f32 = init_params(key)                          # f32 master copy
    params_bf16 = cast_weights(params_f32, jnp.bfloat16)   # cast once at boundary

    # 1) Latency regime (B=8, one grid step, all weights resident) -- exact
    #    f32 path checked tightly against the pure-JAX reference.
    B_small = 8
    x_small = jax.random.normal(xk, (B_small, LAYER_DIMS[0]), dtype=jnp.float32)
    ref_small = reference_forward(x_small, params_f32)

    out_f32 = jax.block_until_ready(
        linear_net_controller2(x_small, params_f32, use_bf16=False))
    assert out_f32.shape == (B_small, LAYER_DIMS[-1]), out_f32.shape
    assert jnp.allclose(out_f32, ref_small, atol=1e-5, rtol=1e-5), \
        "f32-path mismatch vs reference"

    # 2) Default fast path: bf16 weights / MXU operands, f32 accumulation.
    #    Relaxed tolerance (bf16 operand rounding across 6 chained layers).
    out_bf16 = jax.block_until_ready(linear_net_controller2(x_small, params_bf16))
    assert out_bf16.shape == (B_small, LAYER_DIMS[-1]), out_bf16.shape
    assert jnp.allclose(out_bf16, ref_small, atol=1e-1, rtol=1e-1), \
        "bf16-path mismatch vs reference"

    # 3) Throughput regime: tiled path (2 x 256-row tiles on a parallel grid
    #    axis -> both v7x TensorCores get a balanced tile).
    key, xk2 = jax.random.split(key)
    B_big = 512
    x_big = jax.random.normal(xk2, (B_big, LAYER_DIMS[0]), dtype=jnp.float32)
    out_big = jax.block_until_ready(linear_net_controller2(x_big, params_bf16))
    ref_big = reference_forward(x_big, params_f32)
    assert out_big.shape == (B_big, LAYER_DIMS[-1]), out_big.shape
    assert jnp.allclose(out_big, ref_big, atol=1e-1, rtol=1e-1), \
        "tiled bf16-path mismatch vs reference"

    print("KERNEL_OK")
</pallas_src>

<mosaic_0001>
module attributes {stable_mosaic.version = 11 : i64} {
  func.func @_controller_kernel(%arg0: i32, %arg1: memref<8x32xf32, #tpu.memory_space<vmem>>, %arg2: memref<32x64xf32, #tpu.memory_space<vmem>>, %arg3: memref<1x64xf32, #tpu.memory_space<vmem>>, %arg4: memref<64x128xf32, #tpu.memory_space<vmem>>, %arg5: memref<1x128xf32, #tpu.memory_space<vmem>>, %arg6: memref<128x128xf32, #tpu.memory_space<vmem>>, %arg7: memref<1x128xf32, #tpu.memory_space<vmem>>, %arg8: memref<128x256xf32, #tpu.memory_space<vmem>>, %arg9: memref<1x256xf32, #tpu.memory_space<vmem>>, %arg10: memref<256x256xf32, #tpu.memory_space<vmem>>, %arg11: memref<1x256xf32, #tpu.memory_space<vmem>>, %arg12: memref<256x512xf32, #tpu.memory_space<vmem>>, %arg13: memref<1x512xf32, #tpu.memory_space<vmem>>, %arg14: memref<8x512xf32, #tpu.memory_space<vmem>>) attributes {dimension_semantics = [#tpu.dimension_semantics<parallel>], iteration_bounds = array<i64: 1>, scalar_prefetch = 0 : i64, scratch_operands = 0 : i64, tpu.core_type = #tpu.core_type<tc>, window_params = [{transform_indices = @transform_0, window_bounds = array<i64: 8, 32>}, {pipeline_mode = #tpu.pipeline_mode<synchronous>, transform_indices = @transform_1, window_bounds = array<i64: 32, 64>}, {pipeline_mode = #tpu.pipeline_mode<synchronous>, transform_indices = @transform_2, window_bounds = array<i64: 1, 64>}, {pipeline_mode = #tpu.pipeline_mode<synchronous>, transform_indices = @transform_3, window_bounds = array<i64: 64, 128>}, {pipeline_mode = #tpu.pipeline_mode<synchronous>, transform_indices = @transform_4, window_bounds = array<i64: 1, 128>}, {pipeline_mode = #tpu.pipeline_mode<synchronous>, transform_indices = @transform_5, window_bounds = array<i64: 128, 128>}, {pipeline_mode = #tpu.pipeline_mode<synchronous>, transform_indices = @transform_6, window_bounds = array<i64: 1, 128>}, {pipeline_mode = #tpu.pipeline_mode<synchronous>, transform_indices = @transform_7, window_bounds = array<i64: 128, 256>}, {pipeline_mode = #tpu.pipeline_mode<synchronous>, transform_indices = @transform_8, window_bounds = array<i64: 1, 256>}, {pipeline_mode = #tpu.pipeline_mode<synchronous>, transform_indices = @transform_9, window_bounds = array<i64: 256, 256>}, {pipeline_mode = #tpu.pipeline_mode<synchronous>, transform_indices = @transform_10, window_bounds = array<i64: 1, 256>}, {pipeline_mode = #tpu.pipeline_mode<synchronous>, transform_indices = @transform_11, window_bounds = array<i64: 256, 512>}, {pipeline_mode = #tpu.pipeline_mode<synchronous>, transform_indices = @transform_12, window_bounds = array<i64: 1, 512>}, {transform_indices = @transform_13, window_bounds = array<i64: 8, 512>}]} {
    %c0 = arith.constant 0 : index
    %c0_0 = arith.constant 0 : index
    %0 = vector.load %arg1[%c0, %c0_0] : memref<8x32xf32, #tpu.memory_space<vmem>>, vector<8x32xf32>
    %c0_1 = arith.constant 0 : index
    %c0_2 = arith.constant 0 : index
    %1 = vector.load %arg2[%c0_1, %c0_2] : memref<32x64xf32, #tpu.memory_space<vmem>>, vector<32x64xf32>
    %c0_3 = arith.constant 0 : index
    %c0_4 = arith.constant 0 : index
    %2 = vector.load %arg3[%c0_3, %c0_4] : memref<1x64xf32, #tpu.memory_space<vmem>>, vector<1x64xf32>
    %cst = arith.constant dense<0.000000e+00> : vector<8x64xf32>
    %3 = tpu.matmul %0, %1, %cst {dimension_numbers = #tpu.dot_dimension_numbers<[1], [0], [0], [1], [0, 0, 1, 1], [], []>} : vector<8x32xf32>, vector<32x64xf32>, vector<8x64xf32> -> vector<8x64xf32>
    %4 = vector.broadcast %2 : vector<1x64xf32> to vector<8x64xf32>
    %5 = arith.addf %3, %4 : vector<8x64xf32>
    %cst_5 = arith.constant 0.000000e+00 : f32
    %6 = vector.broadcast %cst_5 : f32 to vector<8x64xf32>
    %7 = arith.maximumf %5, %6 : vector<8x64xf32>
    %c0_6 = arith.constant 0 : index
    %c0_7 = arith.constant 0 : index
    %8 = vector.load %arg4[%c0_6, %c0_7] : memref<64x128xf32, #tpu.memory_space<vmem>>, vector<64x128xf32>
    %c0_8 = arith.constant 0 : index
    %c0_9 = arith.constant 0 : index
    %9 = vector.load %arg5[%c0_8, %c0_9] : memref<1x128xf32, #tpu.memory_space<vmem>>, vector<1x128xf32>
    %cst_10 = arith.constant dense<0.000000e+00> : vector<8x128xf32>
    %10 = tpu.matmul %7, %8, %cst_10 {dimension_numbers = #tpu.dot_dimension_numbers<[1], [0], [0], [1], [0, 0, 1, 1], [], []>} : vector<8x64xf32>, vector<64x128xf32>, vector<8x128xf32> -> vector<8x128xf32>
    %11 = vector.broadcast %9 : vector<1x128xf32> to vector<8x128xf32>
    %12 = arith.addf %10, %11 : vector<8x128xf32>
    %cst_11 = arith.constant 0.000000e+00 : f32
    %13 = vector.broadcast %cst_11 : f32 to vector<8x128xf32>
    %14 = arith.maximumf %12, %13 : vector<8x128xf32>
    %c0_12 = arith.constant 0 : index
    %c0_13 = arith.constant 0 : index
    %15 = vector.load %arg6[%c0_12, %c0_13] : memref<128x128xf32, #tpu.memory_space<vmem>>, vector<128x128xf32>
    %c0_14 = arith.constant 0 : index
    %c0_15 = arith.constant 0 : index
    %16 = vector.load %arg7[%c0_14, %c0_15] : memref<1x128xf32, #tpu.memory_space<vmem>>, vector<1x128xf32>
    %cst_16 = arith.constant dense<0.000000e+00> : vector<8x128xf32>
    %17 = tpu.matmul %14, %15, %cst_16 {dimension_numbers = #tpu.dot_dimension_numbers<[1], [0], [0], [1], [0, 0, 1, 1], [], []>} : vector<8x128xf32>, vector<128x128xf32>, vector<8x128xf32> -> vector<8x128xf32>
    %18 = vector.broadcast %16 : vector<1x128xf32> to vector<8x128xf32>
    %19 = arith.addf %17, %18 : vector<8x128xf32>
    %cst_17 = arith.constant 0.000000e+00 : f32
    %20 = vector.broadcast %cst_17 : f32 to vector<8x128xf32>
    %21 = arith.maximumf %19, %20 : vector<8x128xf32>
    %c0_18 = arith.constant 0 : index
    %c0_19 = arith.constant 0 : index
    %22 = vector.load %arg8[%c0_18, %c0_19] : memref<128x256xf32, #tpu.memory_space<vmem>>, vector<128x256xf32>
    %c0_20 = arith.constant 0 : index
    %c0_21 = arith.constant 0 : index
    %23 = vector.load %arg9[%c0_20, %c0_21] : memref<1x256xf32, #tpu.memory_space<vmem>>, vector<1x256xf32>
    %cst_22 = arith.constant dense<0.000000e+00> : vector<8x256xf32>
    %24 = tpu.matmul %21, %22, %cst_22 {dimension_numbers = #tpu.dot_dimension_numbers<[1], [0], [0], [1], [0, 0, 1, 1], [], []>} : vector<8x128xf32>, vector<128x256xf32>, vector<8x256xf32> -> vector<8x256xf32>
    %25 = vector.broadcast %23 : vector<1x256xf32> to vector<8x256xf32>
    %26 = arith.addf %24, %25 : vector<8x256xf32>
    %cst_23 = arith.constant 0.000000e+00 : f32
    %27 = vector.broadcast %cst_23 : f32 to vector<8x256xf32>
    %28 = arith.maximumf %26, %27 : vector<8x256xf32>
    %c0_24 = arith.constant 0 : index
    %c0_25 = arith.constant 0 : index
    %29 = vector.load %arg10[%c0_24, %c0_25] : memref<256x256xf32, #tpu.memory_space<vmem>>, vector<256x256xf32>
    %c0_26 = arith.constant 0 : index
    %c0_27 = arith.constant 0 : index
    %30 = vector.load %arg11[%c0_26, %c0_27] : memref<1x256xf32, #tpu.memory_space<vmem>>, vector<1x256xf32>
    %cst_28 = arith.constant dense<0.000000e+00> : vector<8x256xf32>
    %31 = tpu.matmul %28, %29, %cst_28 {dimension_numbers = #tpu.dot_dimension_numbers<[1], [0], [0], [1], [0, 0, 1, 1], [], []>} : vector<8x256xf32>, vector<256x256xf32>, vector<8x256xf32> -> vector<8x256xf32>
    %32 = vector.broadcast %30 : vector<1x256xf32> to vector<8x256xf32>
    %33 = arith.addf %31, %32 : vector<8x256xf32>
    %cst_29 = arith.constant 0.000000e+00 : f32
    %34 = vector.broadcast %cst_29 : f32 to vector<8x256xf32>
    %35 = arith.maximumf %33, %34 : vector<8x256xf32>
    %c0_30 = arith.constant 0 : index
    %c0_31 = arith.constant 0 : index
    %36 = vector.load %arg12[%c0_30, %c0_31] : memref<256x512xf32, #tpu.memory_space<vmem>>, vector<256x512xf32>
    %c0_32 = arith.constant 0 : index
    %c0_33 = arith.constant 0 : index
    %37 = vector.load %arg13[%c0_32, %c0_33] : memref<1x512xf32, #tpu.memory_space<vmem>>, vector<1x512xf32>
    %cst_34 = arith.constant dense<0.000000e+00> : vector<8x512xf32>
    %38 = tpu.matmul %35, %36, %cst_34 {dimension_numbers = #tpu.dot_dimension_numbers<[1], [0], [0], [1], [0, 0, 1, 1], [], []>} : vector<8x256xf32>, vector<256x512xf32>, vector<8x512xf32> -> vector<8x512xf32>
    %39 = vector.broadcast %37 : vector<1x512xf32> to vector<8x512xf32>
    %40 = arith.addf %38, %39 : vector<8x512xf32>
    %cst_35 = arith.constant 0.000000e+00 : f32
    %41 = vector.broadcast %cst_35 : f32 to vector<8x512xf32>
    %42 = arith.maximumf %40, %41 : vector<8x512xf32>
    %c0_36 = arith.constant 0 : index
    %c0_37 = arith.constant 0 : index
    %43 = vector.load %arg14[%c0_36, %c0_37] : memref<8x512xf32, #tpu.memory_space<vmem>>, vector<8x512xf32>
    tpu.vector_store %arg14[%c0_36, %c0_37], %42 {strides = array<i32>} : memref<8x512xf32, #tpu.memory_space<vmem>>, vector<8x512xf32>,
    return
  }
  func.func @transform_0(%arg0: i32) -> (i32, i32) {
    %c0_i32 = arith.constant 0 : i32
    %c0_i32_0 = arith.constant 0 : i32
    return %arg0, %c0_i32 : i32, i32
  }
  func.func @transform_1(%arg0: i32) -> (i32, i32) {
    %c0_i32 = arith.constant 0 : i32
    %c0_i32_0 = arith.constant 0 : i32
    %c0_i32_1 = arith.constant 0 : i32
    return %c0_i32, %c0_i32_0 : i32, i32
  }
  func.func @transform_2(%arg0: i32) -> (i32, i32) {
    %c0_i32 = arith.constant 0 : i32
    %c0_i32_0 = arith.constant 0 : i32
    %c0_i32_1 = arith.constant 0 : i32
    return %c0_i32, %c0_i32_0 : i32, i32
  }
  func.func @transform_3(%arg0: i32) -> (i32, i32) {
    %c0_i32 = arith.constant 0 : i32
    %c0_i32_0 = arith.constant 0 : i32
    %c0_i32_1 = arith.constant 0 : i32
    return %c0_i32, %c0_i32_0 : i32, i32
  }
  func.func @transform_4(%arg0: i32) -> (i32, i32) {
    %c0_i32 = arith.constant 0 : i32
    %c0_i32_0 = arith.constant 0 : i32
    %c0_i32_1 = arith.constant 0 : i32
    return %c0_i32, %c0_i32_0 : i32, i32
  }
  func.func @transform_5(%arg0: i32) -> (i32, i32) {
    %c0_i32 = arith.constant 0 : i32
    %c0_i32_0 = arith.constant 0 : i32
    %c0_i32_1 = arith.constant 0 : i32
    return %c0_i32, %c0_i32_0 : i32, i32
  }
  func.func @transform_6(%arg0: i32) -> (i32, i32) {
    %c0_i32 = arith.constant 0 : i32
    %c0_i32_0 = arith.constant 0 : i32
    %c0_i32_1 = arith.constant 0 : i32
    return %c0_i32, %c0_i32_0 : i32, i32
  }
  func.func @transform_7(%arg0: i32) -> (i32, i32) {
    %c0_i32 = arith.constant 0 : i32
    %c0_i32_0 = arith.constant 0 : i32
    %c0_i32_1 = arith.constant 0 : i32
    return %c0_i32, %c0_i32_0 : i32, i32
  }
  func.func @transform_8(%arg0: i32) -> (i32, i32) {
    %c0_i32 = arith.constant 0 : i32
    %c0_i32_0 = arith.constant 0 : i32
    %c0_i32_1 = arith.constant 0 : i32
    return %c0_i32, %c0_i32_0 : i32, i32
  }
  func.func @transform_9(%arg0: i32) -> (i32, i32) {
    %c0_i32 = arith.constant 0 : i32
    %c0_i32_0 = arith.constant 0 : i32
    %c0_i32_1 = arith.constant 0 : i32
    return %c0_i32, %c0_i32_0 : i32, i32
  }
  func.func @transform_10(%arg0: i32) -> (i32, i32) {
    %c0_i32 = arith.constant 0 : i32
    %c0_i32_0 = arith.constant 0 : i32
    %c0_i32_1 = arith.constant 0 : i32
    return %c0_i32, %c0_i32_0 : i32, i32
  }
  func.func @transform_11(%arg0: i32) -> (i32, i32) {
    %c0_i32 = arith.constant 0 : i32
    %c0_i32_0 = arith.constant 0 : i32
    %c0_i32_1 = arith.constant 0 : i32
    return %c0_i32, %c0_i32_0 : i32, i32
  }
  func.func @transform_12(%arg0: i32) -> (i32, i32) {
    %c0_i32 = arith.constant 0 : i32
    %c0_i32_0 = arith.constant 0 : i32
    %c0_i32_1 = arith.constant 0 : i32
    return %c0_i32, %c0_i32_0 : i32, i32
  }
  func.func @transform_13(%arg0: i32) -> (i32, i32) {
    %c0_i32 = arith.constant 0 : i32
    %c0_i32_0 = arith.constant 0 : i32
    return %arg0, %c0_i32 : i32, i32
  }
}

module attributes {stable_mosaic.version = 11 : i64} {
  func.func @_controller_kernel(%arg0: i32, %arg1: memref<8x32xf32, #tpu.memory_space<vmem>>, %arg2: memref<32x64xf32, #tpu.memory_space<vmem>>, %arg3: memref<1x64xf32, #tpu.memory_space<vmem>>, %arg4: memref<64x128xf32, #tpu.memory_space<vmem>>, %arg5: memref<1x128xf32, #tpu.memory_space<vmem>>, %arg6: memref<128x128xf32, #tpu.memory_space<vmem>>, %arg7: memref<1x128xf32, #tpu.memory_space<vmem>>, %arg8: memref<128x256xf32, #tpu.memory_space<vmem>>, %arg9: memref<1x256xf32, #tpu.memory_space<vmem>>, %arg10: memref<256x256xf32, #tpu.memory_space<vmem>>, %arg11: memref<1x256xf32, #tpu.memory_space<vmem>>, %arg12: memref<256x512xf32, #tpu.memory_space<vmem>>, %arg13: memref<1x512xf32, #tpu.memory_space<vmem>>, %arg14: memref<8x512xf32, #tpu.memory_space<vmem>>) attributes {dimension_semantics = [#tpu.dimension_semantics<parallel>], iteration_bounds = array<i64: 1>, scalar_prefetch = 0 : i64, scratch_operands = 0 : i64, tpu.core_type = #tpu.core_type<tc>, window_params = [{transform_indices = @transform_0, window_bounds = array<i64: 8, 32>}, {pipeline_mode = #tpu.pipeline_mode<synchronous>, transform_indices = @transform_1, window_bounds = array<i64: 32, 64>}, {pipeline_mode = #tpu.pipeline_mode<synchronous>, transform_indices = @transform_2, window_bounds = array<i64: 1, 64>}, {pipeline_mode = #tpu.pipeline_mode<synchronous>, transform_indices = @transform_3, window_bounds = array<i64: 64, 128>}, {pipeline_mode = #tpu.pipeline_mode<synchronous>, transform_indices = @transform_4, window_bounds = array<i64: 1, 128>}, {pipeline_mode = #tpu.pipeline_mode<synchronous>, transform_indices = @transform_5, window_bounds = array<i64: 128, 128>}, {pipeline_mode = #tpu.pipeline_mode<synchronous>, transform_indices = @transform_6, window_bounds = array<i64: 1, 128>}, {pipeline_mode = #tpu.pipeline_mode<synchronous>, transform_indices = @transform_7, window_bounds = array<i64: 128, 256>}, {pipeline_mode = #tpu.pipeline_mode<synchronous>, transform_indices = @transform_8, window_bounds = array<i64: 1, 256>}, {pipeline_mode = #tpu.pipeline_mode<synchronous>, transform_indices = @transform_9, window_bounds = array<i64: 256, 256>}, {pipeline_mode = #tpu.pipeline_mode<synchronous>, transform_indices = @transform_10, window_bounds = array<i64: 1, 256>}, {pipeline_mode = #tpu.pipeline_mode<synchronous>, transform_indices = @transform_11, window_bounds = array<i64: 256, 512>}, {pipeline_mode = #tpu.pipeline_mode<synchronous>, transform_indices = @transform_12, window_bounds = array<i64: 1, 512>}, {transform_indices = @transform_13, window_bounds = array<i64: 8, 512>}]} {
    %c0 = arith.constant 0 : index
    %c0_0 = arith.constant 0 : index
    %0 = vector.load %arg1[%c0, %c0_0] : memref<8x32xf32, #tpu.memory_space<vmem>>, vector<8x32xf32>
    %c0_1 = arith.constant 0 : index
    %c0_2 = arith.constant 0 : index
    %1 = vector.load %arg2[%c0_1, %c0_2] : memref<32x64xf32, #tpu.memory_space<vmem>>, vector<32x64xf32>
    %c0_3 = arith.constant 0 : index
    %c0_4 = arith.constant 0 : index
    %2 = vector.load %arg3[%c0_3, %c0_4] : memref<1x64xf32, #tpu.memory_space<vmem>>, vector<1x64xf32>
    %cst = arith.constant dense<0.000000e+00> : vector<8x64xf32>
    %3 = tpu.matmul %0, %1, %cst {dimension_numbers = #tpu.dot_dimension_numbers<[1], [0], [0], [1], [0, 0, 1, 1], [], []>} : vector<8x32xf32>, vector<32x64xf32>, vector<8x64xf32> -> vector<8x64xf32>
    %4 = vector.broadcast %2 : vector<1x64xf32> to vector<8x64xf32>
    %5 = arith.addf %3, %4 : vector<8x64xf32>
    %cst_5 = arith.constant 0.000000e+00 : f32
    %6 = vector.broadcast %cst_5 : f32 to vector<8x64xf32>
    %7 = arith.maximumf %5, %6 : vector<8x64xf32>
    %c0_6 = arith.constant 0 : index
    %c0_7 = arith.constant 0 : index
    %8 = vector.load %arg4[%c0_6, %c0_7] : memref<64x128xf32, #tpu.memory_space<vmem>>, vector<64x128xf32>
    %c0_8 = arith.constant 0 : index
    %c0_9 = arith.constant 0 : index
    %9 = vector.load %arg5[%c0_8, %c0_9] : memref<1x128xf32, #tpu.memory_space<vmem>>, vector<1x128xf32>
    %cst_10 = arith.constant dense<0.000000e+00> : vector<8x128xf32>
    %10 = tpu.matmul %7, %8, %cst_10 {dimension_numbers = #tpu.dot_dimension_numbers<[1], [0], [0], [1], [0, 0, 1, 1], [], []>} : vector<8x64xf32>, vector<64x128xf32>, vector<8x128xf32> -> vector<8x128xf32>
    %11 = vector.broadcast %9 : vector<1x128xf32> to vector<8x128xf32>
    %12 = arith.addf %10, %11 : vector<8x128xf32>
    %cst_11 = arith.constant 0.000000e+00 : f32
    %13 = vector.broadcast %cst_11 : f32 to vector<8x128xf32>
    %14 = arith.maximumf %12, %13 : vector<8x128xf32>
    %c0_12 = arith.constant 0 : index
    %c0_13 = arith.constant 0 : index
    %15 = vector.load %arg6[%c0_12, %c0_13] : memref<128x128xf32, #tpu.memory_space<vmem>>, vector<128x128xf32>
    %c0_14 = arith.constant 0 : index
    %c0_15 = arith.constant 0 : index
    %16 = vector.load %arg7[%c0_14, %c0_15] : memref<1x128xf32, #tpu.memory_space<vmem>>, vector<1x128xf32>
    %cst_16 = arith.constant dense<0.000000e+00> : vector<8x128xf32>
    %17 = tpu.matmul %14, %15, %cst_16 {dimension_numbers = #tpu.dot_dimension_numbers<[1], [0], [0], [1], [0, 0, 1, 1], [], []>} : vector<8x128xf32>, vector<128x128xf32>, vector<8x128xf32> -> vector<8x128xf32>
    %18 = vector.broadcast %16 : vector<1x128xf32> to vector<8x128xf32>
    %19 = arith.addf %17, %18 : vector<8x128xf32>
    %cst_17 = arith.constant 0.000000e+00 : f32
    %20 = vector.broadcast %cst_17 : f32 to vector<8x128xf32>
    %21 = arith.maximumf %19, %20 : vector<8x128xf32>
    %c0_18 = arith.constant 0 : index
    %c0_19 = arith.constant 0 : index
    %22 = vector.load %arg8[%c0_18, %c0_19] : memref<128x256xf32, #tpu.memory_space<vmem>>, vector<128x256xf32>
    %c0_20 = arith.constant 0 : index
    %c0_21 = arith.constant 0 : index
    %23 = vector.load %arg9[%c0_20, %c0_21] : memref<1x256xf32, #tpu.memory_space<vmem>>, vector<1x256xf32>
    %cst_22 = arith.constant dense<0.000000e+00> : vector<8x256xf32>
    %24 = tpu.matmul %21, %22, %cst_22 {dimension_numbers = #tpu.dot_dimension_numbers<[1], [0], [0], [1], [0, 0, 1, 1], [], []>} : vector<8x128xf32>, vector<128x256xf32>, vector<8x256xf32> -> vector<8x256xf32>
    %25 = vector.broadcast %23 : vector<1x256xf32> to vector<8x256xf32>
    %26 = arith.addf %24, %25 : vector<8x256xf32>
    %cst_23 = arith.constant 0.000000e+00 : f32
    %27 = vector.broadcast %cst_23 : f32 to vector<8x256xf32>
    %28 = arith.maximumf %26, %27 : vector<8x256xf32>
    %c0_24 = arith.constant 0 : index
    %c0_25 = arith.constant 0 : index
    %29 = vector.load %arg10[%c0_24, %c0_25] : memref<256x256xf32, #tpu.memory_space<vmem>>, vector<256x256xf32>
    %c0_26 = arith.constant 0 : index
    %c0_27 = arith.constant 0 : index
    %30 = vector.load %arg11[%c0_26, %c0_27] : memref<1x256xf32, #tpu.memory_space<vmem>>, vector<1x256xf32>
    %cst_28 = arith.constant dense<0.000000e+00> : vector<8x256xf32>
    %31 = tpu.matmul %28, %29, %cst_28 {dimension_numbers = #tpu.dot_dimension_numbers<[1], [0], [0], [1], [0, 0, 1, 1], [], []>} : vector<8x256xf32>, vector<256x256xf32>, vector<8x256xf32> -> vector<8x256xf32>
    %32 = vector.broadcast %30 : vector<1x256xf32> to vector<8x256xf32>
    %33 = arith.addf %31, %32 : vector<8x256xf32>
    %cst_29 = arith.constant 0.000000e+00 : f32
    %34 = vector.broadcast %cst_29 : f32 to vector<8x256xf32>
    %35 = arith.maximumf %33, %34 : vector<8x256xf32>
    %c0_30 = arith.constant 0 : index
    %c0_31 = arith.constant 0 : index
    %36 = vector.load %arg12[%c0_30, %c0_31] : memref<256x512xf32, #tpu.memory_space<vmem>>, vector<256x512xf32>
    %c0_32 = arith.constant 0 : index
    %c0_33 = arith.constant 0 : index
    %37 = vector.load %arg13[%c0_32, %c0_33] : memref<1x512xf32, #tpu.memory_space<vmem>>, vector<1x512xf32>
    %cst_34 = arith.constant dense<0.000000e+00> : vector<8x512xf32>
    %38 = tpu.matmul %35, %36, %cst_34 {dimension_numbers = #tpu.dot_dimension_numbers<[1], [0], [0], [1], [0, 0, 1, 1], [], []>} : vector<8x256xf32>, vector<256x512xf32>, vector<8x512xf32> -> vector<8x512xf32>
    %39 = vector.broadcast %37 : vector<1x512xf32> to vector<8x512xf32>
    %40 = arith.addf %38, %39 : vector<8x512xf32>
    %cst_35 = arith.constant 0.000000e+00 : f32
    %41 = vector.broadcast %cst_35 : f32 to vector<8x512xf32>
    %42 = arith.maximumf %40, %41 : vector<8x512xf32>
    %c0_36 = arith.constant 0 : index
    %c0_37 = arith.constant 0 : index
    %43 = vector.load %arg14[%c0_36, %c0_37] : memref<8x512xf32, #tpu.memory_space<vmem>>, vector<8x512xf32>
    tpu.vector_store %arg14[%c0_36, %c0_37], %42 {strides = array<i32>} : memref<8x512xf32, #tpu.memory_space<vmem>>, vector<8x512xf32>,
    return
  }
  func.func @transform_0(%arg0: i32) -> (i32, i32) {
    %c0_i32 = arith.constant 0 : i32
    %c0_i32_0 = arith.constant 0 : i32
    return %arg0, %c0_i32 : i32, i32
  }
  func.func @transform_1(%arg0: i32) -> (i32, i32) {
    %c0_i32 = arith.constant 0 : i32
    %c0_i32_0 = arith.constant 0 : i32
    %c0_i32_1 = arith.constant 0 : i32
    return %c0_i32, %c0_i32_0 : i32, i32
  }
  func.func @transform_2(%arg0: i32) -> (i32, i32) {
    %c0_i32 = arith.constant 0 : i32
    %c0_i32_0 = arith.constant 0 : i32
    %c0_i32_1 = arith.constant 0 : i32
    return %c0_i32, %c0_i32_0 : i32, i32
  }
  func.func @transform_3(%arg0: i32) -> (i32, i32) {
    %c0_i32 = arith.constant 0 : i32
    %c0_i32_0 = arith.constant 0 : i32
    %c0_i32_1 = arith.constant 0 : i32
    return %c0_i32, %c0_i32_0 : i32, i32
  }
  func.func @transform_4(%arg0: i32) -> (i32, i32) {
    %c0_i32 = arith.constant 0 : i32
    %c0_i32_0 = arith.constant 0 : i32
    %c0_i32_1 = arith.constant 0 : i32
    return %c0_i32, %c0_i32_0 : i32, i32
  }
  func.func @transform_5(%arg0: i32) -> (i32, i32) {
    %c0_i32 = arith.constant 0 : i32
    %c0_i32_0 = arith.constant 0 : i32
    %c0_i32_1 = arith.constant 0 : i32
    return %c0_i32, %c0_i32_0 : i32, i32
  }
  func.func @transform_6(%arg0: i32) -> (i32, i32) {
    %c0_i32 = arith.constant 0 : i32
    %c0_i32_0 = arith.constant 0 : i32
    %c0_i32_1 = arith.constant 0 : i32
    return %c0_i32, %c0_i32_0 : i32, i32
  }
  func.func @transform_7(%arg0: i32) -> (i32, i32) {
    %c0_i32 = arith.constant 0 : i32
    %c0_i32_0 = arith.constant 0 : i32
    %c0_i32_1 = arith.constant 0 : i32
    return %c0_i32, %c0_i32_0 : i32, i32
  }
  func.func @transform_8(%arg0: i32) -> (i32, i32) {
    %c0_i32 = arith.constant 0 : i32
    %c0_i32_0 = arith.constant 0 : i32
    %c0_i32_1 = arith.constant 0 : i32
    return %c0_i32, %c0_i32_0 : i32, i32
  }
  func.func @transform_9(%arg0: i32) -> (i32, i32) {
    %c0_i32 = arith.constant 0 : i32
    %c0_i32_0 = arith.constant 0 : i32
    %c0_i32_1 = arith.constant 0 : i32
    return %c0_i32, %c0_i32_0 : i32, i32
  }
  func.func @transform_10(%arg0: i32) -> (i32, i32) {
    %c0_i32 = arith.constant 0 : i32
    %c0_i32_0 = arith.constant 0 : i32
    %c0_i32_1 = arith.constant 0 : i32
    return %c0_i32, %c0_i32_0 : i32, i32
  }
  func.func @transform_11(%arg0: i32) -> (i32, i32) {
    %c0_i32 = arith.constant 0 : i32
    %c0_i32_0 = arith.constant 0 : i32
    %c0_i32_1 = arith.constant 0 : i32
    return %c0_i32, %c0_i32_0 : i32, i32
  }
  func.func @transform_12(%arg0: i32) -> (i32, i32) {
    %c0_i32 = arith.constant 0 : i32
    %c0_i32_0 = arith.constant 0 : i32
    %c0_i32_1 = arith.constant 0 : i32
    return %c0_i32, %c0_i32_0 : i32, i32
  }
  func.func @transform_13(%arg0: i32) -> (i32, i32) {
    %c0_i32 = arith.constant 0 : i32
    %c0_i32_0 = arith.constant 0 : i32
    return %arg0, %c0_i32 : i32, i32
  }
}

</mosaic_0001>

<bundles_post_ra>
// kernel: _forward.1
= control target key start
LH: loop header
LB: loop body
LE: loop exit
PB: predicated region body
PF: predicated region fallthrough
CT: control target
= control target key end

     0   :  { %18 = vsyncpa [#allocation3], 0  ;;  %s1823_s0 = inlined_call_operand.hbm [shape: f32[8,32], index: 0, kind: input, shape index: {}]   ;;  %s1824_s1 = inlined_call_operand.hbm [shape: f32[32,64], index: 1, kind: input, shape index: {}]   ;;  %s1825_s2 = inlined_call_operand.vmem [shape: f32[1,64], index: 2, kind: input, shape index: {}]   ;;  %s1826_s3 = inlined_call_operand.hbm [shape: f32[64,128], index: 3, kind: input, shape index: {}]   ;;  %s1827_s4 = inlined_call_operand.vmem [shape: f32[1,128], index: 4, kind: input, shape index: {}]   ;;  %s1828_s5 = inlined_call_operand.hbm [shape: f32[128,128], index: 5, kind: input, shape index: {}]   ;;  %s1829_s6 = inlined_call_operand.vmem [shape: f32[1,128], index: 6, kind: input, shape index: {}]   ;;  %s1830_s7 = inlined_call_operand.hbm [shape: f32[128,256], index: 7, kind: input, shape index: {}]   ;;  %s1831_s8 = inlined_call_operand.vmem [shape: f32[1,256], index: 8, kind: input, shape index: {}]   ;;  %s1832_s9 = inlined_call_operand.hbm [shape: f32[256,256], index: 9, kind: input, shape index: {}]   ;;  %s1833_s10 = inlined_call_operand.vmem [shape: f32[1,256], index: 10, kind: input, shape index: {}]   ;;  %s1834_s11 = inlined_call_operand.hbm [shape: f32[256,512], index: 11, kind: input, shape index: {}]   ;;  %s1835_s12 = inlined_call_operand.vmem [shape: f32[1,512], index: 12, kind: input, shape index: {}]   ;;  %s1836_s13 = inlined_call_operand.hbm [shape: f32[8,512], index: 13, kind: output, shape index: {}]  }
   0x1   :  { %19 = vsyncpa [#allocation6], 0 }
   0x2   :  { %20 = vsyncpa [#allocation9], 0 }
   0x3   :  { %21 = vsyncpa [#allocation12], 0 }
   0x4   :  { %22 = vsyncpa [#allocation4], 0  ;;  %s1563_s25 = smov [#allocation5]   ;;  %s1377_s29 = scalar_lea.hbm %s1824_s1, 512 }
   0x5   :  { %s38_s26 = sshll.u32 %s1563_s25, 4  ;;  %p1378_p0 = scmp.ne.s32.totalorder %s1824_s1, %s1377_s29  ;;  %s39_s26 = int_to_ptr.vmem [resolvable:$true] %s38_s26 }
   0x6   :  { %p1381_p1 = scmp.lt.u32.totalorder %s1377_s29, %s1824_s1 }
   0x8   :  { %p1383_p2 = pnand %p1381_p1, %p1378_p0 }
   0xa   :  { %1386 = shalt.err (!%p1383_p2)
}
   0xb   :  { %s1387_s17 = scalar_lea.vmem %s39_s26, 512  ;;  %p1392_p4 = scmp.lt.s32.totalorder %s39_s26, %s39_s26 }
   0xc   :  { %p1388_p3 = scmp.ne.s32.totalorder %s39_s26, %s1387_s17  ;;  %p1393_p5 = scmp.lt.s32.totalorder %s1387_s17, %s1387_s17 }
   0xe   :  { %p1394_p6 = por %p1393_p5, %p1392_p4 }
  0x10   :  { %p1395_p7 = pnand %p1394_p6, %p1388_p3 }
  0x12   :  { %1398 = shalt.err (!%p1395_p7)
}
  0x13   :  { %s1564_s18 = smov 128   ;;  %s1565_s19 = smov 8  }
  0x14   :  { %44 = dma.hbm_to_vmem [thread:$0]  %s1824_s1, 512, %s39_s26, [#allocation6], %s1564_s18, %s1564_s18, %s1565_s19  }
  0x15   :  { %s1566_s22 = smov [#allocation8]   ;;  %s1399_s27 = scalar_lea.hbm %s1828_s5, 2048 }
  0x16   :  { %s66_s23 = sshll.u32 %s1566_s22, 4  ;;  %p1400_p8 = scmp.ne.s32.totalorder %s1828_s5, %s1399_s27  ;;  %s67_s23 = int_to_ptr.vmem [resolvable:$true] %s66_s23 }
  0x17   :  { %p1403_p9 = scmp.lt.u32.totalorder %s1399_s27, %s1828_s5 }
  0x19   :  { %p1405_p10 = pnand %p1403_p9, %p1400_p8 }
  0x1b   :  { %1408 = shalt.err (!%p1405_p10)
}
  0x1c   :  { %s1409_s15 = scalar_lea.vmem %s67_s23, 2048  ;;  %p1414_p12 = scmp.lt.s32.totalorder %s67_s23, %s67_s23 }
  0x1d   :  { %p1410_p11 = scmp.ne.s32.totalorder %s67_s23, %s1409_s15  ;;  %p1415_p13 = scmp.lt.s32.totalorder %s1409_s15, %s1409_s15 }
  0x1f   :  { %p1416_p0 = por %p1415_p13, %p1414_p12 }
  0x21   :  { %p1417_p1 = pnand %p1416_p0, %p1410_p11 }
  0x23   :  { %1420 = shalt.err (!%p1417_p1)
}
  0x24   :  { %72 = dma.hbm_to_vmem [thread:$0]  %s1828_s5, 2048, %s67_s23, [#allocation9], %s1564_s18, %s1564_s18, %s1565_s19  }
  0x25   :  { %s1567_s16 = smov [#allocation11]   ;;  %s1568_s20 = smov [#allocation2]  }
  0x26   :  { %s94_s17 = sshll.u32 %s1567_s16, 4  ;;  %s29_s21 = sshll.u32 %s1568_s20, 4  ;;  %s95_s17 = int_to_ptr.vmem [resolvable:$true] %s94_s17  ;;  %s30_s21 = int_to_ptr.vmem [resolvable:$true] %s29_s21 }
  0x27   :  { %s1421_s25 = scalar_lea.hbm %s1832_s9, 8192 }
  0x28   :  { %p1422_p2 = scmp.ne.s32.totalorder %s1832_s9, %s1421_s25  ;;  %p1425_p3 = scmp.lt.u32.totalorder %s1421_s25, %s1832_s9 }
  0x2a   :  { %p1427_p4 = pnand %p1425_p3, %p1422_p2 }
  0x2c   :  { %1430 = shalt.err (!%p1427_p4)
}
  0x2d   :  { %s1431_s5 = scalar_lea.vmem %s95_s17, 8192  ;;  %p1436_p6 = scmp.lt.s32.totalorder %s95_s17, %s95_s17 }
  0x2e   :  { %p1432_p5 = scmp.ne.s32.totalorder %s95_s17, %s1431_s5  ;;  %p1437_p7 = scmp.lt.s32.totalorder %s1431_s5, %s1431_s5 }
  0x30   :  { %p1438_p8 = por %p1437_p7, %p1436_p6 }
  0x32   :  { %p1439_p9 = pnand %p1438_p8, %p1432_p5 }
  0x34   :  { %1442 = shalt.err (!%p1439_p9)
}
  0x35   :  { %s1569_s23 = smov 256   ;;  %s1570_s14 = smov 16  }
  0x36   :  { %100 = dma.hbm_to_vmem [thread:$0]  %s1832_s9, 8192, %s95_s17, [#allocation12], %s1569_s23, %s1569_s23, %s1570_s14  }
  0x37   :  { %s1443_s20 = scalar_lea.hbm %s1823_s0, 128 }
  0x38   :  { %p1444_p10 = scmp.ne.s32.totalorder %s1823_s0, %s1443_s20  ;;  %p1447_p11 = scmp.lt.u32.totalorder %s1443_s20, %s1823_s0 }
  0x3a   :  { %p1449_p12 = pnand %p1447_p11, %p1444_p10 }
  0x3c   :  { %1452 = shalt.err (!%p1449_p12)
}
  0x3d   :  { %s1453_s28 = scalar_lea.vmem %s30_s21, 128  ;;  %p1458_p0 = scmp.lt.s32.totalorder %s30_s21, %s30_s21 }
  0x3e   :  { %p1454_p13 = scmp.ne.s32.totalorder %s30_s21, %s1453_s28  ;;  %p1459_p1 = scmp.lt.s32.totalorder %s1453_s28, %s1453_s28 }
  0x40   :  { %p1460_p2 = por %p1459_p1, %p1458_p0 }
  0x42   :  { %p1461_p3 = pnand %p1460_p2, %p1454_p13 }
  0x44   :  { %1464 = shalt.err (!%p1461_p3)
}
  0x45   :  { %32 = dma.hbm_to_vmem [thread:$0]  %s1823_s0, 128, %s30_s21, [#allocation3]  }
  0x46   :  { %s1571_s29 = smov [#allocation7]   ;;  %s1572_s5 = smov [#allocation10]  }
  0x47   :  { %s52_s30 = sshll.u32 %s1571_s29, 4  ;;  %s80_s15 = sshll.u32 %s1572_s5, 4  ;;  %s53_s30 = int_to_ptr.vmem [resolvable:$true] %s52_s30  ;;  %s1707_s15 = int_to_ptr.vmem [resolvable:$true] %s80_s15 }
  0x48   :  { %s1465_s16 = scalar_lea.hbm %s1826_s3, 1024 }
  0x49   :  { %p1466_p4 = scmp.ne.s32.totalorder %s1826_s3, %s1465_s16  ;;  %p1469_p5 = scmp.lt.u32.totalorder %s1465_s16, %s1826_s3 }
  0x4b   :  { %p1471_p6 = pnand %p1469_p5, %p1466_p4 }
  0x4d   :  { %1474 = shalt.err (!%p1471_p6)
}
  0x4e   :  { %s1475_s0 = scalar_lea.vmem %s53_s30, 1024  ;;  %p1480_p8 = scmp.lt.s32.totalorder %s53_s30, %s53_s30 }
  0x4f   :  { %p1476_p7 = scmp.ne.s32.totalorder %s53_s30, %s1475_s0  ;;  %p1481_p9 = scmp.lt.s32.totalorder %s1475_s0, %s1475_s0 }
  0x51   :  { %p1482_p10 = por %p1481_p9, %p1480_p8 }
  0x53   :  { %p1483_p11 = pnand %p1482_p10, %p1476_p7 }
  0x55   :  { %1486 = shalt.err (!%p1483_p11)
}
  0x56   :  { %58 = dma.hbm_to_vmem [thread:$0]  %s1826_s3, 1024, %s53_s30, [#allocation6], %s1564_s18, %s1564_s18, %s1565_s19  }
  0x57   :  { %s1487_s17 = scalar_lea.hbm %s1830_s7, 4096 }
  0x58   :  { %p1488_p12 = scmp.ne.s32.totalorder %s1830_s7, %s1487_s17  ;;  %p1491_p13 = scmp.lt.u32.totalorder %s1487_s17, %s1830_s7 }
  0x5a   :  { %p1493_p0 = pnand %p1491_p13, %p1488_p12 }
  0x5c   :  { %1496 = shalt.err (!%p1493_p0)
}
  0x5d   :  { %s1497_s16 = scalar_lea.vmem %s1707_s15, 4096  ;;  %p1502_p2 = scmp.lt.s32.totalorder %s1707_s15, %s1707_s15 }
  0x5e   :  { %p1498_p1 = scmp.ne.s32.totalorder %s1707_s15, %s1497_s16  ;;  %p1503_p3 = scmp.lt.s32.totalorder %s1497_s16, %s1497_s16 }
  0x60   :  { %p1504_p4 = por %p1503_p3, %p1502_p2 }
  0x62   :  { %p1505_p5 = pnand %p1504_p4, %p1498_p1 }
  0x64   :  { %1508 = shalt.err (!%p1505_p5)
}
  0x65   :  { %86 = dma.hbm_to_vmem [thread:$0]  %s1830_s7, 4096, %s1707_s15, [#allocation9], %s1569_s23, %s1569_s23, %s1570_s14  }
  0x66   :  { %s1573_s19 = smov [#allocation13]   ;;  %s1509_s24 = scalar_lea.hbm %s1834_s11, 16384 }
  0x67   :  { %s108_s30 = sshll.u32 %s1573_s19, 4  ;;  %p1510_p6 = scmp.ne.s32.totalorder %s1834_s11, %s1509_s24  ;;  %s109_s30 = int_to_ptr.vmem [resolvable:$true] %s108_s30 }
  0x68   :  { %p1513_p7 = scmp.lt.u32.totalorder %s1509_s24, %s1834_s11 }
  0x6a   :  { %p1515_p8 = pnand %p1513_p7, %p1510_p6 }
  0x6c   :  { %1518 = shalt.err (!%p1515_p8)
}
  0x6d   :  { %s1519_s28 = scalar_lea.vmem %s109_s30, 16384  ;;  %p1524_p10 = scmp.lt.s32.totalorder %s109_s30, %s109_s30 }
  0x6e   :  { %p1520_p9 = scmp.ne.s32.totalorder %s109_s30, %s1519_s28  ;;  %p1525_p11 = scmp.lt.s32.totalorder %s1519_s28, %s1519_s28 }
  0x70   :  { %p1526_p12 = por %p1525_p11, %p1524_p10 }
  0x72   :  { %p1527_p13 = pnand %p1526_p12, %p1520_p9 }
  0x74   :  { %1530 = shalt.err (!%p1527_p13)
}
  0x75   :  { %s1574_s7 = smov 512   ;;  %s1575_s23 = smov 32  }
  0x76   :  { %114 = dma.hbm_to_vmem [thread:$0]  %s1834_s11, 16384, %s109_s30, [#allocation12], %s1574_s7, %s1574_s7, %s1575_s23  }
  0x77   :  { %1553 = dma.done.wait [#allocation3], 128  }
  0x78   :  { %1554 = vsyncadd [#allocation3], 4294967168 }
  0x79   :  { %1555 = dma.done.wait [#allocation6], 1536  }
  0x7a   :  { %1556 = vsyncadd [#allocation6], 4294965760 }
  0x7b   :  { %1557 = dma.done.wait [#allocation9], 6144  }
  0x7c   :  { %1558 = vsyncadd [#allocation9], 4294961152 }
  0x7d   :  { %1559 = dma.done.wait [#allocation12], 24576  }
  0x7e   :  { %1560 = vsyncadd [#allocation12], 4294942720  ;;  %v1576_v0 = vmov 0.0|0.0   ;;  %vm1577_vm0 = vmmov 0   ;;  %v1578_v1 = vmov 0.0   ;;  %v139_v2 = vld [vmem:[#allocation5] sm:$0xff] }
  0x7f   :  { %1094 = vmatprep.subr.bf16.mxu0 %v1576_v0  ;;  %1037 = vmatprep.mubr.msk.f32.mxu0 %vm1577_vm0, %v1578_v1  ;;  %v140_v3 = vld [vmem:[#allocation5 + $0x8] sm:$0xff]  ;;  %v141_v4 = vld [vmem:[#allocation5 + $0x10] sm:$0xff]  ;;  %v142_v6 = vld [vmem:[#allocation5 + $0x18] sm:$0xff]  ;;  %vm150_vm1 = vcmask 261120   ;;  %vm240_vm2 = vcmask 523264  }
  0x80   :  { %1100 = vmatprep.subr.bf16.mxu1 %v1576_v0  ;;  %1056 = vmatprep.mubr.msk.f32.mxu1 %vm1577_vm0, %v1578_v1  ;;  %v1095_v5 = vpack.c.bf16 %v140_v3, %v139_v2  ;;  %v225_v7 = vld [vmem:[#allocation7] sm:$0xff]  ;;  %v226_v8 = vld [vmem:[#allocation7 + $0x8] sm:$0xff]  ;;  %v227_v9 = vld [vmem:[#allocation7 + $0x10] sm:$0xff]  ;;  %v1098_v11 = vpack.c.bf16 %v142_v6, %v141_v4 }
  0x81   :  { %v228_v10 = vld [vmem:[#allocation7 + $0x18] sm:$0xff]  ;;  %v1101_v12 = vpack.c.bf16 %v226_v8, %v225_v7  ;;  %v229_v14 = vld [vmem:[#allocation7 + $0x20] sm:$0xff]  ;;  %v230_v15 = vld [vmem:[#allocation7 + $0x28] sm:$0xff] }
  0x82   :  { %1096 = vmatpush3.bf16.msra.mxu0 %v1095_v5  ;;  %v1104_v13 = vpack.c.bf16 %v228_v10, %v227_v9  ;;  %v138_v16 = vld [vmem:[#allocation2] sm:$0xff]  ;;  %v1107_v17 = vpack.c.bf16 %v230_v15, %v229_v14  ;;  %v231_v18 = vld [vmem:[#allocation7 + $0x30] sm:$0xff]  ;;  %v315_v22 = vld [vmem:[#allocation8] sm:$0xff] }
  0x83   :  { %1097 = vmatprep.subr.bf16.mxu0 %v1576_v0  ;;  %1102 = vmatpush3.bf16.msra.mxu1 %v1101_v12  ;;  %v232_v19 = vld [vmem:[#allocation7 + $0x38] sm:$0xff]  ;;  %v316_v23 = vld [vmem:[#allocation8 + $0x8] sm:$0xff]  ;;  %v317_v29 = vld [vmem:[#allocation8 + $0x10] sm:$0xff] }
  0x84   :  { %1103 = vmatprep.subr.bf16.mxu1 %v1576_v0  ;;  %v1110_v20 = vpack.c.bf16 %v232_v19, %v231_v18  ;;  %v993_v21 = vld [vmem:[%s1825_s2] ss:$0 sm:$0xff]  ;;  %v1113_v27 = vpack.c.bf16 %v316_v23, %v315_v22  ;;  %v319_v32 = vld [vmem:[#allocation8 + $0x20] sm:$0xff]  ;;  %v320_v33 = vld [vmem:[#allocation8 + $0x28] sm:$0xff] }
  0x85   :  { %v318_v30 = vld [vmem:[#allocation8 + $0x18] sm:$0xff]  ;;  %v1119_v34 = vpack.c.bf16 %v320_v33, %v319_v32  ;;  %v321_v35 = vld [vmem:[#allocation8 + $0x30] sm:$0xff]  ;;  %v323_v38 = vld [vmem:[#allocation8 + $0x40] sm:$0xff] }
  0x86   :  { %1099 = vmatpush3.bf16.msra.mxu0 %v1098_v11  ;;  %v1116_v31 = vpack.c.bf16 %v318_v30, %v317_v29  ;;  %v322_v36 = vld [vmem:[#allocation8 + $0x38] sm:$0xff]  ;;  %v324_v39 = vld [vmem:[#allocation8 + $0x48] sm:$0xff]  ;;  %v325_v41 = vld [vmem:[#allocation8 + $0x50] sm:$0xff] }
  0x87   :  { %1105 = vmatpush3.bf16.msra.mxu1 %v1104_v13  ;;  %v1122_v37 = vpack.c.bf16 %v322_v36, %v321_v35  ;;  %v1125_v40 = vpack.c.bf16 %v324_v39, %v323_v38  ;;  %v326_v42 = vld [vmem:[#allocation8 + $0x58] sm:$0xff]  ;;  %v327_v44 = vld [vmem:[#allocation8 + $0x60] sm:$0xff]  ;;  %v328_v45 = vld [vmem:[#allocation8 + $0x68] sm:$0xff] }
  0x88   :  { %1106 = vmatprep.subr.bf16.mxu1 %v1576_v0  ;;  %v1128_v43 = vpack.c.bf16 %v326_v42, %v325_v41  ;;  %v1131_v46 = vpack.c.bf16 %v328_v45, %v327_v44  ;;  %v329_v47 = vld [vmem:[#allocation8 + $0x70] sm:$0xff]  ;;  %v330_v48 = vld [vmem:[#allocation8 + $0x78] sm:$0xff]  ;;  %v410_v50 = vld [vmem:[#allocation10 + $0x8] sm:$0xff] }
  0x89   :  { %1038 = vmatmul.mubr.msk.f32.vlgmr.msra.gmra.mrb[0].mxu0 %vm150_vm1, %v138_v16  ;;  %v1134_v49 = vpack.c.bf16 %v330_v48, %v329_v47  ;;  %v412_v51 = vld [vmem:[#allocation10 + $0x18] sm:$0xff]  ;;  %v409_v54 = vld [vmem:[#allocation10] sm:$0xff]  ;;  %v411_v55 = vld [vmem:[#allocation10 + $0x10] sm:$0xff] }
  0x8a   :  { %v1136_v52 = vpack.c.bf16 %v412_v51, %v410_v50  ;;  %v995_v53 = vld [vmem:[%s1827_s4] ss:$0 sm:$0xff]  ;;  %v414_v57 = vld [vmem:[#allocation10 + $0x28] sm:$0xff]  ;;  %v1138_v61 = vpack.c.bf16 %v411_v55, %v409_v54  ;;  %v415_v2 = vld [vmem:[#allocation10 + $0x30] sm:$0xff] }
  0x8b   :  { %1108 = vmatpush3.bf16.msra.mxu1 %v1107_v17  ;;  %v416_v58 = vld [vmem:[#allocation10 + $0x38] sm:$0xff]  ;;  %v418_v3 = vld [vmem:[#allocation10 + $0x48] sm:$0xff]  ;;  %v417_v7 = vld [vmem:[#allocation10 + $0x40] sm:$0xff] }
  0x8c   :  { %1109 = vmatprep.subr.bf16.mxu1 %v1576_v0  ;;  %v1140_v63 = vpack.c.bf16 %v416_v58, %v414_v57  ;;  %v420_v4 = vld [vmem:[#allocation10 + $0x58] sm:$0xff]  ;;  %v419_v8 = vld [vmem:[#allocation10 + $0x50] sm:$0xff]  ;;  %v422_v9 = vld [vmem:[#allocation10 + $0x68] sm:$0xff] }
  0x8d   :  { %v1144_v6 = vpack.c.bf16 %v420_v4, %v418_v3  ;;  %v424_v10 = vld [vmem:[#allocation10 + $0x78] sm:$0xff]  ;;  %v1146_v11 = vpack.c.bf16 %v419_v8, %v417_v7  ;;  %v421_v13 = vld [vmem:[#allocation10 + $0x60] sm:$0xff]  ;;  %v423_v14 = vld [vmem:[#allocation10 + $0x70] sm:$0xff] }
  0x8e   :  { %v1148_v12 = vpack.c.bf16 %v424_v10, %v422_v9  ;;  %v426_v15 = vld [vmem:[#allocation10 + $0x88] sm:$0xff]  ;;  %v428_v16 = vld [vmem:[#allocation10 + $0x98] sm:$0xff]  ;;  %v1150_v17 = vpack.c.bf16 %v423_v14, %v421_v13  ;;  %v425_v19 = vld [vmem:[#allocation10 + $0x80] sm:$0xff] }
  0x8f   :  { %1111 = vmatpush3.bf16.msra.mxu1 %v1110_v20  ;;  %v1152_v18 = vpack.c.bf16 %v428_v16, %v426_v15  ;;  %v430_v20 = vld [vmem:[#allocation10 + $0xa8] sm:$0xff]  ;;  %v433_v30 = vld [vmem:[#allocation10 + $0xc0] sm:$0xff]  ;;  %v533_v45 = vld [vmem:[#allocation11 + $0x38] sm:$0xff] }
  0x90   :  { %1112 = vmatprep.subr.bf16.mxu1 %v1576_v0  ;;  %v438_v33 = vld [vmem:[#allocation10 + $0xe8] sm:$0xff]  ;;  %v437_v36 = vld [vmem:[#allocation10 + $0xe0] sm:$0xff]  ;;  %v537_v51 = vld [vmem:[#allocation11 + $0x58] sm:$0xff] }
  0x91   :  { %v527_v39 = vld [vmem:[#allocation11 + $0x8] sm:$0xff]  ;;  %v526_v41 = vld [vmem:[#allocation11] sm:$0xff]  ;;  %v536_v55 = vld [vmem:[#allocation11 + $0x50] sm:$0xff] }
  0x92   :  { %v531_v44 = vld [vmem:[#allocation11 + $0x28] sm:$0xff]  ;;  %v530_v48 = vld [vmem:[#allocation11 + $0x20] sm:$0xff]  ;;  %v541_v57 = vld [vmem:[#allocation11 + $0x78] sm:$0xff] }
  0x93   :  { %v1172_v47 = vpack.c.bf16 %v533_v45, %v531_v44  ;;  %v535_v50 = vld [vmem:[#allocation11 + $0x48] sm:$0xff]  ;;  %v534_v54 = vld [vmem:[#allocation11 + $0x40] sm:$0xff]  ;;  %v544_v4 = vld [vmem:[#allocation11 + $0x90] sm:$0xff] }
  0x94   :  { %v1178_v58 = vpack.c.bf16 %v536_v55, %v534_v54  ;;  %v542_v3 = vld [vmem:[#allocation11 + $0x80] sm:$0xff]  ;;  %v548_v10 = vld [vmem:[#allocation11 + $0xb0] sm:$0xff] }
  0x95   :  { %v1186_v7 = vpack.c.bf16 %v544_v4, %v542_v3  ;;  %v546_v9 = vld [vmem:[#allocation11 + $0xa0] sm:$0xff]  ;;  %v552_v16 = vld [vmem:[#allocation11 + $0xd0] sm:$0xff] }
  0x96   :  { %v1190_v13 = vpack.c.bf16 %v548_v10, %v546_v9  ;;  %v550_v15 = vld [vmem:[#allocation11 + $0xc0] sm:$0xff]  ;;  %v572_v45 = vld [vmem:[#allocation11 + $0x170] sm:$0xff] }
  0x97   :  { %v570_v44 = vld [vmem:[#allocation11 + $0x160] sm:$0xff] }
  0x98   :  { %v582_v4 = vld [vmem:[#allocation11 + $0x1c0] sm:$0xff] }
  0x99   :  { %v586_v10 = vld [vmem:[#allocation11 + $0x1e0] sm:$0xff] }
 0x15c   :  { %v220_v24 = vpop.f32.mrb[0].mxu0 }
 0x15d   :  { %v221_v25 = vadd.f32 %v993_v21, %v220_v24  ;;  %v1039_v26 = vpop.f32.mrb[1].mxu0  ;;  %v432_v21 = vld [vmem:[#allocation10 + $0xb8] sm:$0xff]  ;;  %v429_v24 = vld [vmem:[#allocation10 + $0xa0] sm:$0xff] }
 0x15e   :  { %v1156_v23 = vpack.c.bf16 %v432_v21, %v430_v20  ;;  %v434_v26 = vld [vmem:[#allocation10 + $0xc8] sm:$0xff]  ;;  %v554_v20 = vld [vmem:[#allocation11 + $0xe0] sm:$0xff]  ;;  %v556_v21 = vld [vmem:[#allocation11 + $0xf0] sm:$0xff] }
 0x15f   :  { %v224_v28 = vmax.f32 %v221_v25, 0.0  ;;  %v431_v25 = vld [vmem:[#allocation10 + $0xb0] sm:$0xff] }
 0x161   :  { %1057 = vmatmul.mubr.msk.f32.vlgmr.msra.gmra.mrb[0].mxu1 %vm240_vm2, %v224_v28  ;;  %v1158_v28 = vpack.c.bf16 %v431_v25, %v429_v24  ;;  %v1198_v24 = vpack.c.bf16 %v556_v21, %v554_v20  ;;  %v684_v21 = vld [vmem:[#allocation13 + $0x48] sm:$0xff] }
 0x162   :  { %1114 = vmatpush3.bf16.msra.mxu1 %v1113_v27  ;;  %1091 = vmatprep.mubr.msk.f32.mxu1 %vm1577_vm0, %v1578_v1  ;;  %v436_v27 = vld [vmem:[#allocation10 + $0xd8] sm:$0xff] }
 0x163   :  { %1115 = vmatprep.subr.bf16.mxu1 %v1576_v0  ;;  %v1160_v29 = vpack.c.bf16 %v436_v27, %v434_v26  ;;  %v558_v26 = vld [vmem:[#allocation11 + $0x100] sm:$0xff]  ;;  %v560_v27 = vld [vmem:[#allocation11 + $0x110] sm:$0xff] }
 0x166   :  { %1117 = vmatpush3.bf16.msra.mxu1 %v1116_v31  ;;  %v435_v31 = vld [vmem:[#allocation10 + $0xd0] sm:$0xff] }
 0x167   :  { %1118 = vmatprep.subr.bf16.mxu1 %v1576_v0  ;;  %v1162_v32 = vpack.c.bf16 %v435_v31, %v433_v30  ;;  %v1202_v30 = vpack.c.bf16 %v560_v27, %v558_v26  ;;  %v692_v27 = vld [vmem:[#allocation13 + $0x88] sm:$0xff] }
 0x16a   :  { %1120 = vmatpush3.bf16.msra.mxu1 %v1119_v34  ;;  %v440_v34 = vld [vmem:[#allocation10 + $0xf8] sm:$0xff] }
 0x16b   :  { %1121 = vmatprep.subr.bf16.mxu1 %v1576_v0  ;;  %v1164_v35 = vpack.c.bf16 %v440_v34, %v438_v33  ;;  %v564_v33 = vld [vmem:[#allocation11 + $0x130] sm:$0xff]  ;;  %v567_v34 = vld [vmem:[#allocation11 + $0x148] sm:$0xff] }
 0x16e   :  { %1123 = vmatpush3.bf16.msra.mxu1 %v1122_v37  ;;  %v439_v37 = vld [vmem:[#allocation10 + $0xf0] sm:$0xff] }
 0x16f   :  { %1124 = vmatprep.subr.bf16.mxu1 %v1576_v0  ;;  %v1166_v38 = vpack.c.bf16 %v439_v37, %v437_v36 }
 0x172   :  { %1126 = vmatpush3.bf16.msra.mxu1 %v1125_v40  ;;  %v529_v40 = vld [vmem:[#allocation11 + $0x18] sm:$0xff] }
 0x173   :  { %1127 = vmatprep.subr.bf16.mxu1 %v1576_v0  ;;  %v1168_v42 = vpack.c.bf16 %v529_v40, %v527_v39  ;;  %v568_v39 = vld [vmem:[#allocation11 + $0x150] sm:$0xff]  ;;  %v571_v40 = vld [vmem:[#allocation11 + $0x168] sm:$0xff] }
 0x175   :  { %1169 = vmatprep.subr.bf16.mxu0 %v1168_v42 }
 0x176   :  { %1129 = vmatpush3.bf16.msra.mxu1 %v1128_v43  ;;  %v528_v43 = vld [vmem:[#allocation11 + $0x10] sm:$0xff] }
 0x177   :  { %1130 = vmatprep.subr.bf16.mxu1 %v1576_v0 }
 0x17a   :  { %1132 = vmatpush3.bf16.msra.mxu1 %v1131_v46  ;;  %v1170_v46 = vpack.c.bf16 %v528_v43, %v526_v41  ;;  %v573_v41 = vld [vmem:[#allocation11 + $0x178] sm:$0xff] }
 0x17b   :  { %1133 = vmatprep.subr.bf16.mxu1 %v1576_v0  ;;  %v413_v0 = vld [vmem:[#allocation10 + $0x20] sm:$0xff]  ;;  %v1212_v43 = vpack.c.bf16 %v573_v41, %v571_v40  ;;  %v712_v40 = vld [vmem:[#allocation13 + $0x128] sm:$0xff] }
 0x17c   :  { %v1142_v5 = vpack.c.bf16 %v415_v2, %v413_v0  ;;  %1171 = vmatpush1.bf16.msra.mxu0 %v1170_v46  ;;  %v575_v46 = vld [vmem:[#allocation11 + $0x188] sm:$0xff] }
 0x17d   :  { %1173 = vmatprep.subr.bf16.mxu0 %v1172_v47  ;;  %v577_v47 = vld [vmem:[#allocation11 + $0x198] sm:$0xff] }
 0x17e   :  { %1135 = vmatpush3.bf16.msra.mxu1 %v1134_v49  ;;  %v532_v49 = vld [vmem:[#allocation11 + $0x30] sm:$0xff] }
 0x17f   :  { %1137 = vmatprep.subr.bf16.mxu1 %v1136_v52  ;;  %v1174_v52 = vpack.c.bf16 %v532_v49, %v530_v48  ;;  %v1214_v48 = vpack.c.bf16 %v572_v45, %v570_v44  ;;  %v1216_v49 = vpack.c.bf16 %v577_v47, %v575_v46  ;;  %v716_v45 = vld [vmem:[#allocation13 + $0x148] sm:$0xff] }
 0x180   :  { %v720_v46 = vld [vmem:[#allocation13 + $0x168] sm:$0xff] }
 0x181   :  { %1175 = vmatpush1.bf16.msra.mxu0 %v1174_v52  ;;  %v579_v52 = vld [vmem:[#allocation11 + $0x1a8] sm:$0xff]  ;;  %v1252_v47 = vpack.c.bf16 %v720_v46, %v716_v45 }
 0x234   :  { %v310_v56 = vpop.f32.mrb[0].mxu1 }
 0x235   :  { %v311_v59 = vadd.f32 %v995_v53, %v310_v56  ;;  %v1058_v60 = vpop.f32.mrb[1].mxu1  ;;  %v1176_v53 = vpack.c.bf16 %v537_v51, %v535_v50  ;;  %v539_v56 = vld [vmem:[#allocation11 + $0x68] sm:$0xff]  ;;  %v574_v50 = vld [vmem:[#allocation11 + $0x180] sm:$0xff]  ;;  %v576_v51 = vld [vmem:[#allocation11 + $0x190] sm:$0xff] }
 0x236   :  { %v538_v60 = vld [vmem:[#allocation11 + $0x60] sm:$0xff]  ;;  %v1218_v54 = vpack.c.bf16 %v576_v51, %v574_v50  ;;  %v724_v51 = vld [vmem:[#allocation13 + $0x188] sm:$0xff] }
 0x237   :  { %v314_v62 = vmax.f32 %v311_v59, 0.0  ;;  %1177 = vmatprep.subr.bf16.mxu0 %v1176_v53  ;;  %v1180_v59 = vpack.c.bf16 %v541_v57, %v539_v56  ;;  %v581_v53 = vld [vmem:[#allocation11 + $0x1b8] sm:$0xff]  ;;  %v578_v56 = vld [vmem:[#allocation11 + $0x1a0] sm:$0xff]  ;;  %v580_v57 = vld [vmem:[#allocation11 + $0x1b0] sm:$0xff] }
 0x238   :  { %1179 = vmatpush1.bf16.msra.mxu0 %v1178_v58  ;;  %v1220_v55 = vpack.c.bf16 %v581_v53, %v579_v52  ;;  %v583_v58 = vld [vmem:[#allocation11 + $0x1c8] sm:$0xff] }
 0x239   :  { %1092 = vmatmul.mubr.f32.vlgmr.msra.gmra.mrb[2].mxu1 %v314_v62  ;;  %v543_v62 = vld [vmem:[#allocation11 + $0x88] sm:$0xff]  ;;  %1181 = vmatprep.subr.bf16.mxu0 %v1180_v59  ;;  %v585_v59 = vld [vmem:[#allocation11 + $0x1d8] sm:$0xff] }
 0x23a   :  { %1139 = vmatpush1.bf16.msra.mxu1 %v1138_v61  ;;  %517 = vmatprep.mubr.f32.mxu1 %v1578_v1  ;;  %v427_v1 = vld [vmem:[#allocation10 + $0x90] sm:$0xff]  ;;  %v728_v52 = vld [vmem:[#allocation13 + $0x1a8] sm:$0xff] }
 0x23b   :  { %1141 = vmatprep.subr.bf16.mxu1 %v1140_v63  ;;  %v1154_v22 = vpack.c.bf16 %v427_v1, %v425_v19  ;;  %v540_v61 = vld [vmem:[#allocation11 + $0x70] sm:$0xff]  ;;  %v545_v63 = vld [vmem:[#allocation11 + $0x98] sm:$0xff]  ;;  %v1194_v19 = vpack.c.bf16 %v552_v16, %v550_v15  ;;  %v1256_v53 = vpack.c.bf16 %v728_v52, %v724_v51 }
 0x23c   :  { %v1182_v0 = vpack.c.bf16 %v540_v61, %v538_v60  ;;  %v1184_v2 = vpack.c.bf16 %v545_v63, %v543_v62  ;;  %v1222_v60 = vpack.c.bf16 %v580_v57, %v578_v56  ;;  %v1224_v61 = vpack.c.bf16 %v585_v59, %v583_v58  ;;  %v997_v62 = vld [vmem:[%s1829_s6] ss:$0 sm:$0xff]  ;;  %v732_v57 = vld [vmem:[#allocation13 + $0x1c8] sm:$0xff] }
 0x23d   :  { %v678_v15 = vld [vmem:[#allocation13 + $0x18] sm:$0xff]  ;;  %v736_v58 = vld [vmem:[#allocation13 + $0x1e8] sm:$0xff] }
 0x23e   :  { %1143 = vmatpush1.bf16.msra.mxu1 %v1142_v5  ;;  %v547_v5 = vld [vmem:[#allocation11 + $0xa8] sm:$0xff]  ;;  %1183 = vmatpush1.bf16.msra.mxu0 %v1182_v0  ;;  %v1260_v59 = vpack.c.bf16 %v736_v58, %v732_v57  ;;  %v686_v51 = vld [vmem:[#allocation13 + $0x58] sm:$0xff]  ;;  %v685_v57 = vld [vmem:[#allocation13 + $0x50] sm:$0xff] }
 0x23f   :  { %1145 = vmatprep.subr.bf16.mxu1 %v1144_v6  ;;  %v549_v6 = vld [vmem:[#allocation11 + $0xb8] sm:$0xff]  ;;  %1185 = vmatprep.subr.bf16.mxu0 %v1184_v2  ;;  %v689_v58 = vld [vmem:[#allocation13 + $0x70] sm:$0xff] }
 0x240   :  { %v1188_v8 = vpack.c.bf16 %v549_v6, %v547_v5  ;;  %v584_v5 = vld [vmem:[#allocation11 + $0x1d0] sm:$0xff]  ;;  %v690_v52 = vld [vmem:[#allocation13 + $0x78] sm:$0xff] }
 0x241   :  { %v1226_v6 = vpack.c.bf16 %v584_v5, %v582_v4  ;;  %v743_v4 = vld [vmem:[#allocation13 + $0x220] sm:$0xff] }
 0x242   :  { %1147 = vmatpush1.bf16.msra.mxu1 %v1146_v11  ;;  %v551_v11 = vld [vmem:[#allocation11 + $0xc8] sm:$0xff]  ;;  %1187 = vmatpush1.bf16.msra.mxu0 %v1186_v7 }
 0x243   :  { %1149 = vmatprep.subr.bf16.mxu1 %v1148_v12  ;;  %v553_v12 = vld [vmem:[#allocation11 + $0xd8] sm:$0xff]  ;;  %1189 = vmatprep.subr.bf16.mxu0 %v1188_v8  ;;  %v587_v7 = vld [vmem:[#allocation11 + $0x1e8] sm:$0xff] }
 0x244   :  { %v1192_v14 = vpack.c.bf16 %v553_v12, %v551_v11  ;;  %v589_v8 = vld [vmem:[#allocation11 + $0x1f8] sm:$0xff]  ;;  %v588_v11 = vld [vmem:[#allocation11 + $0x1f0] sm:$0xff] }
 0x245   :  { %v1228_v9 = vpack.c.bf16 %v589_v8, %v587_v7  ;;  %v1230_v12 = vpack.c.bf16 %v588_v11, %v586_v10  ;;  %v752_v7 = vld [vmem:[#allocation13 + $0x268] sm:$0xff]  ;;  %v751_v10 = vld [vmem:[#allocation13 + $0x260] sm:$0xff] }
 0x246   :  { %1151 = vmatpush1.bf16.msra.mxu1 %v1150_v17  ;;  %v555_v17 = vld [vmem:[#allocation11 + $0xe8] sm:$0xff]  ;;  %1191 = vmatpush1.bf16.msra.mxu0 %v1190_v13 }
 0x247   :  { %1153 = vmatprep.subr.bf16.mxu1 %v1152_v18  ;;  %v557_v18 = vld [vmem:[#allocation11 + $0xf8] sm:$0xff]  ;;  %1193 = vmatprep.subr.bf16.mxu0 %v1192_v14  ;;  %v676_v13 = vld [vmem:[#allocation13 + $0x8] sm:$0xff] }
 0x248   :  { %v1196_v1 = vpack.c.bf16 %v557_v18, %v555_v17  ;;  %v680_v14 = vld [vmem:[#allocation13 + $0x28] sm:$0xff]  ;;  %v682_v17 = vld [vmem:[#allocation13 + $0x38] sm:$0xff]  ;;  %v675_v18 = vld [vmem:[#allocation13] sm:$0xff] }
 0x249   :  { %v1232_v16 = vpack.c.bf16 %v680_v14, %v676_v13  ;;  %v760_v13 = vld [vmem:[#allocation13 + $0x2a8] sm:$0xff] }
 0x24a   :  { %1155 = vmatpush1.bf16.msra.mxu1 %v1154_v22  ;;  %v559_v22 = vld [vmem:[#allocation11 + $0x108] sm:$0xff]  ;;  %1195 = vmatpush1.bf16.msra.mxu0 %v1194_v19  ;;  %v679_v19 = vld [vmem:[#allocation13 + $0x20] sm:$0xff] }
 0x24b   :  { %1157 = vmatprep.subr.bf16.mxu1 %v1156_v23  ;;  %v561_v23 = vld [vmem:[#allocation11 + $0x118] sm:$0xff]  ;;  %1197 = vmatprep.subr.bf16.mxu0 %v1196_v1  ;;  %v1296_v1 = vpack.c.bf16 %v682_v17, %v678_v15  ;;  %v1234_v20 = vpack.c.bf16 %v679_v19, %v675_v18  ;;  %v755_v15 = vld [vmem:[#allocation13 + $0x280] sm:$0xff]  ;;  %v764_v18 = vld [vmem:[#allocation13 + $0x2c8] sm:$0xff] }
 0x24c   :  { %v1200_v25 = vpack.c.bf16 %v561_v23, %v559_v22  ;;  %v688_v22 = vld [vmem:[#allocation13 + $0x68] sm:$0xff] }
 0x24d   :  { %v1236_v23 = vpack.c.bf16 %v688_v22, %v684_v21  ;;  %v768_v19 = vld [vmem:[#allocation13 + $0x2e8] sm:$0xff]  ;;  %v767_v21 = vld [vmem:[#allocation13 + $0x2e0] sm:$0xff] }
 0x24e   :  { %1159 = vmatpush1.bf16.msra.mxu1 %v1158_v28  ;;  %v563_v28 = vld [vmem:[#allocation11 + $0x128] sm:$0xff]  ;;  %1199 = vmatpush1.bf16.msra.mxu0 %v1198_v24  ;;  %v683_v24 = vld [vmem:[#allocation13 + $0x40] sm:$0xff] }
 0x24f   :  { %1161 = vmatprep.subr.bf16.mxu1 %v1160_v29  ;;  %v565_v29 = vld [vmem:[#allocation11 + $0x138] sm:$0xff]  ;;  %1201 = vmatprep.subr.bf16.mxu0 %v1200_v25  ;;  %v687_v25 = vld [vmem:[#allocation13 + $0x60] sm:$0xff] }
 0x250   :  { %v1204_v31 = vpack.c.bf16 %v565_v29, %v563_v28  ;;  %v1238_v26 = vpack.c.bf16 %v687_v25, %v683_v24  ;;  %v696_v28 = vld [vmem:[#allocation13 + $0xa8] sm:$0xff] }
 0x251   :  { %v1240_v29 = vpack.c.bf16 %v696_v28, %v692_v27  ;;  %v776_v24 = vld [vmem:[#allocation13 + $0x328] sm:$0xff]  ;;  %v775_v27 = vld [vmem:[#allocation13 + $0x320] sm:$0xff] }
 0x252   :  { %1163 = vmatpush1.bf16.msra.mxu1 %v1162_v32  ;;  %v562_v32 = vld [vmem:[#allocation11 + $0x120] sm:$0xff]  ;;  %1203 = vmatpush1.bf16.msra.mxu0 %v1202_v30 }
 0x253   :  { %1165 = vmatprep.subr.bf16.mxu1 %v1164_v35  ;;  %v569_v35 = vld [vmem:[#allocation11 + $0x158] sm:$0xff]  ;;  %v1206_v36 = vpack.c.bf16 %v564_v33, %v562_v32  ;;  %1205 = vmatprep.subr.bf16.mxu0 %v1204_v31  ;;  %v691_v30 = vld [vmem:[#allocation13 + $0x80] sm:$0xff]  ;;  %v700_v33 = vld [vmem:[#allocation13 + $0xc8] sm:$0xff] }
 0x254   :  { %v1208_v37 = vpack.c.bf16 %v569_v35, %v567_v34  ;;  %v695_v31 = vld [vmem:[#allocation13 + $0xa0] sm:$0xff]  ;;  %v704_v34 = vld [vmem:[#allocation13 + $0xe8] sm:$0xff] }
 0x255   :  { %v1242_v32 = vpack.c.bf16 %v695_v31, %v691_v30  ;;  %v1244_v35 = vpack.c.bf16 %v704_v34, %v700_v33  ;;  %v784_v30 = vld [vmem:[#allocation13 + $0x368] sm:$0xff]  ;;  %v783_v33 = vld [vmem:[#allocation13 + $0x360] sm:$0xff] }
 0x256   :  { %1167 = vmatpush1.bf16.msra.mxu1 %v1166_v38  ;;  %v566_v38 = vld [vmem:[#allocation11 + $0x140] sm:$0xff]  ;;  %1207 = vmatpush1.bf16.msra.mxu0 %v1206_v36 }
 0x257   :  { %v1210_v42 = vpack.c.bf16 %v568_v39, %v566_v38  ;;  %1209 = vmatprep.subr.bf16.mxu0 %v1208_v37  ;;  %1233 = vmatprep.subr.bf16.mxu1 %v1232_v16  ;;  %v699_v36 = vld [vmem:[#allocation13 + $0xc0] sm:$0xff]  ;;  %v708_v39 = vld [vmem:[#allocation13 + $0x108] sm:$0xff] }
 0x258   :  { %v703_v37 = vld [vmem:[#allocation13 + $0xe0] sm:$0xff]  ;;  %v1248_v41 = vpack.c.bf16 %v712_v40, %v708_v39 }
 0x259   :  { %v1246_v38 = vpack.c.bf16 %v703_v37, %v699_v36  ;;  %v759_v16 = vld [vmem:[#allocation13 + $0x2a0] sm:$0xff]  ;;  %v792_v36 = vld [vmem:[#allocation13 + $0x3a8] sm:$0xff] }
 0x25a   :  { %1211 = vmatpush1.bf16.msra.mxu0 %v1210_v42  ;;  %v707_v42 = vld [vmem:[#allocation13 + $0x100] sm:$0xff]  ;;  %v1274_v17 = vpack.c.bf16 %v759_v16, %v755_v15  ;;  %v722_v15 = vld [vmem:[#allocation13 + $0x178] sm:$0xff] }
 0x25b   :  { %1213 = vmatprep.subr.bf16.mxu0 %v1212_v43  ;;  %v711_v43 = vld [vmem:[#allocation13 + $0x120] sm:$0xff] }
 0x25c   :  { %v1250_v44 = vpack.c.bf16 %v711_v43, %v707_v42 }
 0x25e   :  { %1215 = vmatpush1.bf16.msra.mxu0 %v1214_v48  ;;  %v715_v48 = vld [vmem:[#allocation13 + $0x140] sm:$0xff] }
 0x25f   :  { %1217 = vmatprep.subr.bf16.mxu0 %v1216_v49  ;;  %v719_v49 = vld [vmem:[#allocation13 + $0x160] sm:$0xff] }
 0x260   :  { %v1254_v50 = vpack.c.bf16 %v719_v49, %v715_v48  ;;  %v677_v48 = vld [vmem:[#allocation13 + $0x10] sm:$0xff] }
 0x261   :  { %v681_v49 = vld [vmem:[#allocation13 + $0x30] sm:$0xff] }
 0x262   :  { %1219 = vmatpush1.bf16.msra.mxu0 %v1218_v54  ;;  %v723_v54 = vld [vmem:[#allocation13 + $0x180] sm:$0xff] }
 0x263   :  { %1221 = vmatprep.subr.bf16.mxu0 %v1220_v55  ;;  %v727_v55 = vld [vmem:[#allocation13 + $0x1a0] sm:$0xff] }
 0x264   :  { %v1258_v56 = vpack.c.bf16 %v727_v55, %v723_v54  ;;  %v1298_v54 = vpack.c.bf16 %v681_v49, %v677_v48 }
 0x266   :  { %1223 = vmatpush1.bf16.msra.mxu0 %v1222_v60  ;;  %v731_v60 = vld [vmem:[#allocation13 + $0x1c0] sm:$0xff] }
 0x267   :  { %1225 = vmatprep.subr.bf16.mxu0 %v1224_v61  ;;  %v735_v61 = vld [vmem:[#allocation13 + $0x1e0] sm:$0xff] }
 0x26a   :  { %1227 = vmatpush1.bf16.msra.mxu0 %v1226_v6  ;;  %v748_v6 = vld [vmem:[#allocation13 + $0x248] sm:$0xff] }
 0x26b   :  { %1229 = vmatprep.subr.bf16.mxu0 %v1228_v9  ;;  %v1268_v8 = vpack.c.bf16 %v752_v7, %v748_v6  ;;  %v747_v9 = vld [vmem:[#allocation13 + $0x240] sm:$0xff]  ;;  %v701_v6 = vld [vmem:[#allocation13 + $0xd0] sm:$0xff] }
 0x26c   :  { %v1270_v11 = vpack.c.bf16 %v751_v10, %v747_v9  ;;  %v705_v7 = vld [vmem:[#allocation13 + $0xf0] sm:$0xff]  ;;  %v714_v9 = vld [vmem:[#allocation13 + $0x138] sm:$0xff] }
 0x26d   :  { %v1310_v10 = vpack.c.bf16 %v705_v7, %v701_v6  ;;  %v785_v6 = vld [vmem:[#allocation13 + $0x370] sm:$0xff]  ;;  %v790_v7 = vld [vmem:[#allocation13 + $0x398] sm:$0xff] }
 0x26e   :  { %1231 = vmatpush1.bf16.msra.mxu0 %v1230_v12  ;;  %v756_v12 = vld [vmem:[#allocation13 + $0x288] sm:$0xff] }
 0x26f   :  { %1297 = vmatprep.subr.bf16.mxu0 %v1296_v1  ;;  %v1272_v14 = vpack.c.bf16 %v760_v13, %v756_v12  ;;  %v1276_v1 = vpack.c.bf16 %v768_v19, %v764_v18  ;;  %v709_v12 = vld [vmem:[#allocation13 + $0x110] sm:$0xff] }
 0x270   :  { %v713_v13 = vld [vmem:[#allocation13 + $0x130] sm:$0xff] }
 0x271   :  { %v1314_v16 = vpack.c.bf16 %v713_v13, %v709_v12  ;;  %v717_v18 = vld [vmem:[#allocation13 + $0x150] sm:$0xff]  ;;  %v791_v12 = vld [vmem:[#allocation13 + $0x3a0] sm:$0xff] }
 0x272   :  { %v721_v19 = vld [vmem:[#allocation13 + $0x170] sm:$0xff] }
 0x273   :  { %v789_v13 = vld [vmem:[#allocation13 + $0x390] sm:$0xff] }
 0x30c   :  { %v404_v63 = vpop.f32.mrb[2].mxu1 }
 0x30d   :  { %v405_v0 = vadd.f32 %v997_v62, %v404_v63  ;;  %v1093_v2 = vpop.f32.mrb[3].mxu1  ;;  %v1262_v62 = vpack.c.bf16 %v735_v61, %v731_v60  ;;  %v740_v63 = vld [vmem:[#allocation13 + $0x208] sm:$0xff]  ;;  %v698_v60 = vld [vmem:[#allocation13 + $0xb8] sm:$0xff]  ;;  %v1302_v61 = vpack.c.bf16 %v689_v58, %v685_v57  ;;  %v769_v57 = vld [vmem:[#allocation13 + $0x2f0] sm:$0xff] }
 0x30e   :  { %v774_v58 = vld [vmem:[#allocation13 + $0x318] sm:$0xff] }
 0x30f   :  { %v408_v3 = vmax.f32 %v405_v0, 0.0  ;;  %v744_v0 = vld [vmem:[#allocation13 + $0x228] sm:$0xff] }
 0x310   :  { %v1264_v2 = vpack.c.bf16 %v744_v0, %v740_v63  ;;  %v693_v63 = vld [vmem:[#allocation13 + $0x90] sm:$0xff] }
 0x311   :  { %518 = vmatmul.mubr.f32.vlgmr.msra.gmra.mrb[4].mxu1 %v408_v3  ;;  %v739_v3 = vld [vmem:[#allocation13 + $0x200] sm:$0xff]  ;;  %v697_v0 = vld [vmem:[#allocation13 + $0xb0] sm:$0xff] }
 0x312   :  { %1235 = vmatpush1.bf16.msra.mxu1 %v1234_v20  ;;  %v1266_v5 = vpack.c.bf16 %v743_v4, %v739_v3  ;;  %v763_v20 = vld [vmem:[#allocation13 + $0x2c0] sm:$0xff]  ;;  %v706_v3 = vld [vmem:[#allocation13 + $0xf8] sm:$0xff]  ;;  %v1306_v4 = vpack.c.bf16 %v697_v0, %v693_v63  ;;  %v777_v63 = vld [vmem:[#allocation13 + $0x330] sm:$0xff] }
 0x313   :  { %1237 = vmatprep.subr.bf16.mxu1 %v1236_v23  ;;  %v1278_v22 = vpack.c.bf16 %v767_v21, %v763_v20  ;;  %v772_v23 = vld [vmem:[#allocation13 + $0x308] sm:$0xff]  ;;  %v730_v20 = vld [vmem:[#allocation13 + $0x1b8] sm:$0xff]  ;;  %v1318_v21 = vpack.c.bf16 %v721_v19, %v717_v18 }
 0x314   :  { %v1280_v25 = vpack.c.bf16 %v776_v24, %v772_v23  ;;  %v725_v23 = vld [vmem:[#allocation13 + $0x190] sm:$0xff]  ;;  %v782_v0 = vld [vmem:[#allocation13 + $0x358] sm:$0xff]  ;;  %v800_v18 = vld [vmem:[#allocation13 + $0x3e8] sm:$0xff] }
 0x315   :  { %v729_v24 = vld [vmem:[#allocation13 + $0x1b0] sm:$0xff]  ;;  %v798_v19 = vld [vmem:[#allocation13 + $0x3d8] sm:$0xff] }
 0x316   :  { %1239 = vmatpush1.bf16.msra.mxu1 %v1238_v26  ;;  %v771_v26 = vld [vmem:[#allocation13 + $0x300] sm:$0xff] }
 0x317   :  { %1241 = vmatprep.subr.bf16.mxu1 %v1240_v29  ;;  %v1282_v28 = vpack.c.bf16 %v775_v27, %v771_v26  ;;  %v780_v29 = vld [vmem:[#allocation13 + $0x348] sm:$0xff]  ;;  %v738_v26 = vld [vmem:[#allocation13 + $0x1f8] sm:$0xff]  ;;  %v1322_v27 = vpack.c.bf16 %v729_v24, %v725_v23 }
 0x318   :  { %v1284_v31 = vpack.c.bf16 %v784_v30, %v780_v29  ;;  %v733_v29 = vld [vmem:[#allocation13 + $0x1d0] sm:$0xff] }
 0x319   :  { %v737_v30 = vld [vmem:[#allocation13 + $0x1f0] sm:$0xff] }
 0x31a   :  { %1243 = vmatpush1.bf16.msra.mxu1 %v1242_v32  ;;  %v779_v32 = vld [vmem:[#allocation13 + $0x340] sm:$0xff] }
 0x31b   :  { %1245 = vmatprep.subr.bf16.mxu1 %v1244_v35  ;;  %v1286_v34 = vpack.c.bf16 %v783_v33, %v779_v32  ;;  %v788_v35 = vld [vmem:[#allocation13 + $0x388] sm:$0xff]  ;;  %v746_v32 = vld [vmem:[#allocation13 + $0x238] sm:$0xff]  ;;  %v1326_v33 = vpack.c.bf16 %v737_v30, %v733_v29 }
 0x31c   :  { %v1288_v37 = vpack.c.bf16 %v792_v36, %v788_v35  ;;  %v741_v35 = vld [vmem:[#allocation13 + $0x210] sm:$0xff] }
 0x31d   :  { %v745_v36 = vld [vmem:[#allocation13 + $0x230] sm:$0xff] }
 0x31e   :  { %1247 = vmatpush1.bf16.msra.mxu1 %v1246_v38  ;;  %v443_v38 = vlaneseq }
 0x31f   :  { %1249 = vmatprep.subr.bf16.mxu1 %v1248_v41  ;;  %v441_v41 = vld [vmem:[%s1831_s8] sm:$0x3] }
 0x320   :  { %v1786_v39 = vshrl.u32 %v443_v38, 7  ;;  %v754_v38 = vld [vmem:[#allocation13 + $0x278] sm:$0xff] }
 0x322   :  { %1251 = vmatpush1.bf16.msra.mxu1 %v1250_v44  ;;  %v1789_v40 = vsub.s32 0, %v1786_v39  ;;  %v1795_v42 = vsub.s32 1, %v1786_v39 }
 0x323   :  { %1253 = vmatprep.subr.bf16.mxu1 %v1252_v47 }
 0x324   :  { %v446_v43 = vrot.slane %v441_v41, %v1789_v40  ;;  %v450_v44 = vrot.slane %v441_v41, %v1795_v42  ;;  %v1330_v41 = vpack.c.bf16 %v745_v36, %v741_v35 }
 0x326   :  { %1255 = vmatpush1.bf16.msra.mxu1 %v1254_v50 }
 0x327   :  { %1257 = vmatprep.subr.bf16.mxu1 %v1256_v53 }
 0x32a   :  { %1259 = vmatpush1.bf16.msra.mxu1 %v1258_v56  ;;  %v1300_v56 = vpack.c.bf16 %v690_v52, %v686_v51  ;;  %v761_v51 = vld [vmem:[#allocation13 + $0x2b0] sm:$0xff]  ;;  %v766_v52 = vld [vmem:[#allocation13 + $0x2d8] sm:$0xff] }
 0x32b   :  { %1261 = vmatprep.subr.bf16.mxu1 %v1260_v59  ;;  %v694_v59 = vld [vmem:[#allocation13 + $0x98] sm:$0xff] }
 0x32e   :  { %1263 = vmatpush1.bf16.msra.mxu1 %v1262_v62  ;;  %v1304_v62 = vpack.c.bf16 %v698_v60, %v694_v59  ;;  %v778_v59 = vld [vmem:[#allocation13 + $0x338] sm:$0xff] }
 0x32f   :  { %1265 = vmatprep.subr.bf16.mxu1 %v1264_v2  ;;  %v702_v2 = vld [vmem:[#allocation13 + $0xd8] sm:$0xff] }
 0x332   :  { %1267 = vmatpush1.bf16.msra.mxu1 %v1266_v5  ;;  %v1308_v5 = vpack.c.bf16 %v706_v3, %v702_v2  ;;  %v786_v2 = vld [vmem:[#allocation13 + $0x378] sm:$0xff] }
 0x333   :  { %1269 = vmatprep.subr.bf16.mxu1 %v1268_v8  ;;  %v710_v8 = vld [vmem:[#allocation13 + $0x118] sm:$0xff] }
 0x336   :  { %1271 = vmatpush1.bf16.msra.mxu1 %v1270_v11  ;;  %v1312_v11 = vpack.c.bf16 %v714_v9, %v710_v8  ;;  %v794_v8 = vld [vmem:[#allocation13 + $0x3b8] sm:$0xff] }
 0x337   :  { %1273 = vmatprep.subr.bf16.mxu1 %v1272_v14  ;;  %v718_v14 = vld [vmem:[#allocation13 + $0x158] sm:$0xff] }
 0x33a   :  { %1275 = vmatpush1.bf16.msra.mxu1 %v1274_v17  ;;  %v1316_v17 = vpack.c.bf16 %v722_v15, %v718_v14  ;;  %v793_v15 = vld [vmem:[#allocation13 + $0x3b0] sm:$0xff] }
 0x33b   :  { %1277 = vmatprep.subr.bf16.mxu1 %v1276_v1  ;;  %v726_v1 = vld [vmem:[#allocation13 + $0x198] sm:$0xff] }
 0x33e   :  { %1279 = vmatpush1.bf16.msra.mxu1 %v1278_v22  ;;  %v1320_v22 = vpack.c.bf16 %v730_v20, %v726_v1  ;;  %v802_v20 = vld [vmem:[#allocation13 + $0x3f8] sm:$0xff] }
 0x33f   :  { %1281 = vmatprep.subr.bf16.mxu1 %v1280_v25  ;;  %v734_v25 = vld [vmem:[#allocation13 + $0x1d8] sm:$0xff]  ;;  %v1356_v23 = vpack.c.bf16 %v802_v20, %v798_v19 }
 0x342   :  { %1283 = vmatpush1.bf16.msra.mxu1 %v1282_v28  ;;  %v1324_v28 = vpack.c.bf16 %v738_v26, %v734_v25  ;;  %v797_v25 = vld [vmem:[#allocation13 + $0x3d0] sm:$0xff] }
 0x343   :  { %1285 = vmatprep.subr.bf16.mxu1 %v1284_v31  ;;  %v742_v31 = vld [vmem:[#allocation13 + $0x218] sm:$0xff]  ;;  %v801_v26 = vld [vmem:[#allocation13 + $0x3f0] sm:$0xff] }
 0x346   :  { %1287 = vmatpush1.bf16.msra.mxu1 %v1286_v34  ;;  %v1328_v34 = vpack.c.bf16 %v746_v32, %v742_v31 }
 0x347   :  { %1289 = vmatprep.subr.bf16.mxu1 %v1288_v37  ;;  %v750_v37 = vld [vmem:[#allocation13 + $0x258] sm:$0xff] }
 0x3e4   :  { %v519_v45 = vpop.f32.mrb[4].mxu1 }
 0x3e5   :  { %v520_v46 = vadd.f32 %v519_v45, %v446_v43  ;;  %v521_v47 = vpop.f32.mrb[5].mxu1  ;;  %v1332_v43 = vpack.c.bf16 %v754_v38, %v750_v37  ;;  %v753_v45 = vld [vmem:[#allocation13 + $0x270] sm:$0xff]  ;;  %v815_v37 = vsub.s32 2, %v1786_v39  ;;  %v803_v38 = vld [vmem:[%s1835_s12] sm:$0xf] }
 0x3e6   :  { %v522_v50 = vadd.f32 %v521_v47, %v450_v44  ;;  %v749_v44 = vld [vmem:[#allocation13 + $0x250] sm:$0xff]  ;;  %v762_v47 = vld [vmem:[#allocation13 + $0x2b8] sm:$0xff] }
 0x3e7   :  { %v524_v55 = vmax.f32 %v520_v46, 0.0  ;;  %v758_v46 = vld [vmem:[#allocation13 + $0x298] sm:$0xff]  ;;  %v1334_v48 = vpack.c.bf16 %v753_v45, %v749_v44  ;;  %v816_v44 = vrot.slane %v803_v38, %v815_v37  ;;  %v812_v45 = vrot.slane %v803_v38, %v1795_v42 }
 0x3e8   :  { %v525_v53 = vmax.f32 %v522_v50, 0.0  ;;  %v1336_v49 = vpack.c.bf16 %v762_v47, %v758_v46  ;;  %v757_v50 = vld [vmem:[#allocation13 + $0x290] sm:$0xff] }
 0x3ea   :  { %666 = vmatprep.mubr.f32.mxu0 %v525_v53  ;;  %v770_v53 = vld [vmem:[#allocation13 + $0x2f8] sm:$0xff] }
 0x3eb   :  { %667 = vmatmul.mubr.f32.vlgmr.msra.gmra.mrb[2].mxu0 %v524_v55  ;;  %v1340_v55 = vpack.c.bf16 %v770_v53, %v766_v52 }
 0x3ec   :  { %1299 = vmatpush1.bf16.msra.mxu0 %v1298_v54  ;;  %v1338_v54 = vpack.c.bf16 %v761_v51, %v757_v50 }
 0x3ed   :  { %1301 = vmatprep.subr.bf16.mxu0 %v1300_v56  ;;  %v765_v56 = vld [vmem:[#allocation13 + $0x2d0] sm:$0xff] }
 0x3ee   :  { %v1342_v60 = vpack.c.bf16 %v769_v57, %v765_v56 }
 0x3f0   :  { %1303 = vmatpush1.bf16.msra.mxu0 %v1302_v61  ;;  %v1344_v61 = vpack.c.bf16 %v778_v59, %v774_v58 }
 0x3f1   :  { %1305 = vmatprep.subr.bf16.mxu0 %v1304_v62  ;;  %v773_v62 = vld [vmem:[#allocation13 + $0x310] sm:$0xff] }
 0x3f2   :  { %v1346_v3 = vpack.c.bf16 %v777_v63, %v773_v62 }
 0x3f4   :  { %1307 = vmatpush1.bf16.msra.mxu0 %v1306_v4  ;;  %v1348_v4 = vpack.c.bf16 %v786_v2, %v782_v0 }
 0x3f5   :  { %1309 = vmatprep.subr.bf16.mxu0 %v1308_v5  ;;  %v781_v5 = vld [vmem:[#allocation13 + $0x350] sm:$0xff] }
 0x3f6   :  { %v1350_v9 = vpack.c.bf16 %v785_v6, %v781_v5 }
 0x3f8   :  { %1311 = vmatpush1.bf16.msra.mxu0 %v1310_v10  ;;  %v1352_v10 = vpack.c.bf16 %v794_v8, %v790_v7 }
 0x3f9   :  { %1313 = vmatprep.subr.bf16.mxu0 %v1312_v11  ;;  %v787_v11 = vld [vmem:[#allocation13 + $0x380] sm:$0xff] }
 0x3fa   :  { %v1290_v14 = vpack.c.bf16 %v791_v12, %v787_v11 }
 0x3fc   :  { %1315 = vmatpush1.bf16.msra.mxu0 %v1314_v16  ;;  %v1354_v16 = vpack.c.bf16 %v793_v15, %v789_v13  ;;  %1291 = vmatpush1.bf16.msra.mxu1 %v1290_v14 }
 0x3fd   :  { %1317 = vmatprep.subr.bf16.mxu0 %v1316_v17  ;;  %v796_v17 = vld [vmem:[#allocation13 + $0x3c8] sm:$0xff] }
 0x3fe   :  { %v1292_v1 = vpack.c.bf16 %v800_v18, %v796_v17 }
 0x400   :  { %1319 = vmatpush1.bf16.msra.mxu0 %v1318_v21  ;;  %v795_v21 = vld [vmem:[#allocation13 + $0x3c0] sm:$0xff]  ;;  %1293 = vmatprep.subr.bf16.mxu1 %v1292_v1 }
 0x401   :  { %1321 = vmatprep.subr.bf16.mxu0 %v1320_v22  ;;  %v799_v22 = vld [vmem:[#allocation13 + $0x3e0] sm:$0xff] }
 0x402   :  { %v1294_v24 = vpack.c.bf16 %v799_v22, %v795_v21 }
 0x404   :  { %1323 = vmatpush1.bf16.msra.mxu0 %v1322_v27  ;;  %v1358_v27 = vpack.c.bf16 %v801_v26, %v797_v25  ;;  %1295 = vmatpush1.bf16.msra.mxu1 %v1294_v24 }
 0x405   :  { %1325 = vmatprep.subr.bf16.mxu0 %v1324_v28  ;;  %v590_v28 = vld [vmem:[%s1833_s10] sm:$0x3]  ;;  %s1579_s10 = smov [#allocation14]  }
 0x406   :  { %v595_v29 = vrot.slane %v590_v28, %v1789_v40  ;;  %v599_v30 = vrot.slane %v590_v28, %v1795_v42  ;;  %s981_s3 = sshll.u32 %s1579_s10, 4  ;;  %s982_s3 = int_to_ptr.vmem [resolvable:$true] %s981_s3 }
 0x407   :  { %s1531_s12 = scalar_lea.vmem %s982_s3, 512  ;;  %p1536_p1 = scmp.lt.s32.totalorder %s982_s3, %s982_s3 }
 0x408   :  { %1327 = vmatpush1.bf16.msra.mxu0 %v1326_v33  ;;  %p1532_p0 = scmp.ne.s32.totalorder %s982_s3, %s1531_s12  ;;  %p1537_p2 = scmp.lt.s32.totalorder %s1531_s12, %s1531_s12 }
 0x409   :  { %1329 = vmatprep.subr.bf16.mxu0 %v1328_v34 }
 0x40a   :  { %p1538_p3 = por %p1537_p2, %p1536_p1 }
 0x40c   :  { %1331 = vmatpush1.bf16.msra.mxu0 %v1330_v41  ;;  %v819_v41 = vsub.s32 3, %v1786_v39  ;;  %p1539_p4 = pnand %p1538_p3, %p1532_p0 }
 0x40d   :  { %1333 = vmatprep.subr.bf16.mxu0 %v1332_v43  ;;  %v808_v43 = vrot.slane %v803_v38, %v1789_v40 }
 0x40e   :  { %v820_v46 = vrot.slane %v803_v38, %v819_v41 }
 0x410   :  { %1335 = vmatpush1.bf16.msra.mxu0 %v1334_v48 }
 0x411   :  { %1337 = vmatprep.subr.bf16.mxu0 %v1336_v49 }
 0x414   :  { %1339 = vmatpush1.bf16.msra.mxu0 %v1338_v54 }
 0x415   :  { %1341 = vmatprep.subr.bf16.mxu0 %v1340_v55 }
 0x418   :  { %1343 = vmatpush1.bf16.msra.mxu0 %v1342_v60 }
 0x419   :  { %1345 = vmatprep.subr.bf16.mxu0 %v1344_v61 }
 0x41c   :  { %1347 = vmatpush1.bf16.msra.mxu0 %v1346_v3 }
 0x41d   :  { %1349 = vmatprep.subr.bf16.mxu0 %v1348_v4 }
 0x420   :  { %1351 = vmatpush1.bf16.msra.mxu0 %v1350_v9 }
 0x421   :  { %1353 = vmatprep.subr.bf16.mxu0 %v1352_v10 }
 0x424   :  { %1355 = vmatpush1.bf16.msra.mxu0 %v1354_v16 }
 0x425   :  { %1357 = vmatprep.subr.bf16.mxu0 %v1356_v23 }
 0x428   :  { %1359 = vmatpush1.bf16.msra.mxu0 %v1358_v27 }
 0x4be   :  { %v668_v31 = vpop.f32.mrb[2].mxu0 }
 0x4bf   :  { %v669_v32 = vadd.f32 %v668_v31, %v595_v29  ;;  %v670_v33 = vpop.f32.mrb[3].mxu0 }
 0x4c0   :  { %v671_v34 = vadd.f32 %v670_v33, %v599_v30 }
 0x4c1   :  { %v673_v36 = vmax.f32 %v669_v32, 0.0 }
 0x4c2   :  { %v674_v35 = vmax.f32 %v671_v34, 0.0 }
 0x4c4   :  { %889 = vmatprep.mubr.f32.mxu1 %v674_v35  ;;  %960 = vmatprep.mubr.f32.mxu0 %v674_v35 }
 0x4c5   :  { %890 = vmatmul.mubr.f32.vlgmr.msra.gmra.mrb[6].mxu1 %v673_v36  ;;  %961 = vmatmul.mubr.f32.vlgmr.msra.gmra.mrb[4].mxu0 %v673_v36 }
 0x598   :  { %v891_v47 = vpop.f32.mrb[6].mxu1  ;;  %v962_v48 = vpop.f32.mrb[4].mxu0 }
 0x599   :  { %v892_v49 = vadd.f32 %v891_v47, %v808_v43  ;;  %v963_v50 = vadd.f32 %v962_v48, %v816_v44  ;;  %v893_v51 = vpop.f32.mrb[7].mxu1  ;;  %v964_v52 = vpop.f32.mrb[5].mxu0 }
 0x59a   :  { %v894_v53 = vadd.f32 %v893_v51, %v812_v45  ;;  %v965_v54 = vadd.f32 %v964_v52, %v820_v46 }
 0x59b   :  { %v967_v55 = vmax.f32 %v892_v49, 0.0  ;;  %v969_v56 = vmax.f32 %v963_v50, 0.0 }
 0x59c   :  { %v968_v57 = vmax.f32 %v894_v53, 0.0  ;;  %v970_v39 = vmax.f32 %v965_v54, 0.0 }
 0x59d   :  { %971 = vst [vmem:[#allocation14] sm:$0xff] %v967_v55  ;;  %973 = vst [vmem:[#allocation14 + $0x10] sm:$0xff] %v969_v56 }
 0x59e   :  { %972 = vst [vmem:[#allocation14 + $0x8] sm:$0xff] %v968_v57  ;;  %974 = vst [vmem:[#allocation14 + $0x18] sm:$0xff] %v970_v39 }
 0x59f   :  { %1542 = shalt.err (!%p1539_p4)
}
 0x5a0   :  { %s1543_s30 = scalar_lea.hbm %s1836_s13, 512 }
 0x5a1   :  { %p1544_p5 = scmp.ne.s32.totalorder %s1836_s13, %s1543_s30  ;;  %p1547_p6 = scmp.lt.u32.totalorder %s1543_s30, %s1836_s13 }
 0x5a3   :  { %p1549_p7 = pnand %p1547_p6, %p1544_p5 }
 0x5a5   :  { %1552 = shalt.err (!%p1549_p7)
}
 0x5a6   :  { %984 = dma.vmem_to_hbm [thread:$0]  %s982_s3, 512, %s1836_s13, [#allocation4]  }
 0x5a7   :  { %1561 = dma.done.wait [#allocation4], 512  }
 0x5a8   :  { %1562 = vsyncadd [#allocation4], 4294966784 }
 0x5a9   :  { %988 = vsyncpa [#allocation3], 1 }
 0x5aa   :  { %989 = vsyncpa [#allocation6], 1 }
 0x5ab   :  { %990 = vsyncpa [#allocation9], 1 }
 0x5ac   :  { %991 = vsyncpa [#allocation12], 1 }
 0x5ad   :  { %992 = vsyncpa [#allocation4], 1 }

// kernel: _forward.1
= control target key start
LH: loop header
LB: loop body
LE: loop exit
PB: predicated region body
PF: predicated region fallthrough
CT: control target
= control target key end

     0   :  { %18 = vsyncpa [#allocation3], 0  ;;  %s1823_s0 = inlined_call_operand.hbm [shape: f32[8,32], index: 0, kind: input, shape index: {}]   ;;  %s1824_s1 = inlined_call_operand.hbm [shape: f32[32,64], index: 1, kind: input, shape index: {}]   ;;  %s1825_s2 = inlined_call_operand.vmem [shape: f32[1,64], index: 2, kind: input, shape index: {}]   ;;  %s1826_s3 = inlined_call_operand.hbm [shape: f32[64,128], index: 3, kind: input, shape index: {}]   ;;  %s1827_s4 = inlined_call_operand.vmem [shape: f32[1,128], index: 4, kind: input, shape index: {}]   ;;  %s1828_s5 = inlined_call_operand.hbm [shape: f32[128,128], index: 5, kind: input, shape index: {}]   ;;  %s1829_s6 = inlined_call_operand.vmem [shape: f32[1,128], index: 6, kind: input, shape index: {}]   ;;  %s1830_s7 = inlined_call_operand.hbm [shape: f32[128,256], index: 7, kind: input, shape index: {}]   ;;  %s1831_s8 = inlined_call_operand.vmem [shape: f32[1,256], index: 8, kind: input, shape index: {}]   ;;  %s1832_s9 = inlined_call_operand.hbm [shape: f32[256,256], index: 9, kind: input, shape index: {}]   ;;  %s1833_s10 = inlined_call_operand.vmem [shape: f32[1,256], index: 10, kind: input, shape index: {}]   ;;  %s1834_s11 = inlined_call_operand.hbm [shape: f32[256,512], index: 11, kind: input, shape index: {}]   ;;  %s1835_s12 = inlined_call_operand.vmem [shape: f32[1,512], index: 12, kind: input, shape index: {}]   ;;  %s1836_s13 = inlined_call_operand.hbm [shape: f32[8,512], index: 13, kind: output, shape index: {}]  }
   0x1   :  { %19 = vsyncpa [#allocation6], 0 }
   0x2   :  { %20 = vsyncpa [#allocation9], 0 }
   0x3   :  { %21 = vsyncpa [#allocation12], 0 }
   0x4   :  { %22 = vsyncpa [#allocation4], 0  ;;  %s1563_s25 = smov [#allocation5]   ;;  %s1377_s29 = scalar_lea.hbm %s1824_s1, 512 }
   0x5   :  { %s38_s26 = sshll.u32 %s1563_s25, 4  ;;  %p1378_p0 = scmp.ne.s32.totalorder %s1824_s1, %s1377_s29  ;;  %s39_s26 = int_to_ptr.vmem [resolvable:$true] %s38_s26 }
   0x6   :  { %p1381_p1 = scmp.lt.u32.totalorder %s1377_s29, %s1824_s1 }
   0x8   :  { %p1383_p2 = pnand %p1381_p1, %p1378_p0 }
   0xa   :  { %1386 = shalt.err (!%p1383_p2)
}
   0xb   :  { %s1387_s17 = scalar_lea.vmem %s39_s26, 512  ;;  %p1392_p4 = scmp.lt.s32.totalorder %s39_s26, %s39_s26 }
   0xc   :  { %p1388_p3 = scmp.ne.s32.totalorder %s39_s26, %s1387_s17  ;;  %p1393_p5 = scmp.lt.s32.totalorder %s1387_s17, %s1387_s17 }
   0xe   :  { %p1394_p6 = por %p1393_p5, %p1392_p4 }
  0x10   :  { %p1395_p7 = pnand %p1394_p6, %p1388_p3 }
  0x12   :  { %1398 = shalt.err (!%p1395_p7)
}
  0x13   :  { %s1564_s18 = smov 128   ;;  %s1565_s19 = smov 8  }
  0x14   :  { %44 = dma.hbm_to_vmem [thread:$0]  %s1824_s1, 512, %s39_s26, [#allocation6], %s1564_s18, %s1564_s18, %s1565_s19  }
  0x15   :  { %s1566_s22 = smov [#allocation8]   ;;  %s1399_s27 = scalar_lea.hbm %s1828_s5, 2048 }
  0x16   :  { %s66_s23 = sshll.u32 %s1566_s22, 4  ;;  %p1400_p8 = scmp.ne.s32.totalorder %s1828_s5, %s1399_s27  ;;  %s67_s23 = int_to_ptr.vmem [resolvable:$true] %s66_s23 }
  0x17   :  { %p1403_p9 = scmp.lt.u32.totalorder %s1399_s27, %s1828_s5 }
  0x19   :  { %p1405_p10 = pnand %p1403_p9, %p1400_p8 }
  0x1b   :  { %1408 = shalt.err (!%p1405_p10)
}
  0x1c   :  { %s1409_s15 = scalar_lea.vmem %s67_s23, 2048  ;;  %p1414_p12 = scmp.lt.s32.totalorder %s67_s23, %s67_s23 }
  0x1d   :  { %p1410_p11 = scmp.ne.s32.totalorder %s67_s23, %s1409_s15  ;;  %p1415_p13 = scmp.lt.s32.totalorder %s1409_s15, %s1409_s15 }
  0x1f   :  { %p1416_p0 = por %p1415_p13, %p1414_p12 }
  0x21   :  { %p1417_p1 = pnand %p1416_p0, %p1410_p11 }
  0x23   :  { %1420 = shalt.err (!%p1417_p1)
}
  0x24   :  { %72 = dma.hbm_to_vmem [thread:$0]  %s1828_s5, 2048, %s67_s23, [#allocation9], %s1564_s18, %s1564_s18, %s1565_s19  }
  0x25   :  { %s1567_s16 = smov [#allocation11]   ;;  %s1568_s20 = smov [#allocation2]  }
  0x26   :  { %s94_s17 = sshll.u32 %s1567_s16, 4  ;;  %s29_s21 = sshll.u32 %s1568_s20, 4  ;;  %s95_s17 = int_to_ptr.vmem [resolvable:$true] %s94_s17  ;;  %s30_s21 = int_to_ptr.vmem [resolvable:$true] %s29_s21 }
  0x27   :  { %s1421_s25 = scalar_lea.hbm %s1832_s9, 8192 }
  0x28   :  { %p1422_p2 = scmp.ne.s32.totalorder %s1832_s9, %s1421_s25  ;;  %p1425_p3 = scmp.lt.u32.totalorder %s1421_s25, %s1832_s9 }
  0x2a   :  { %p1427_p4 = pnand %p1425_p3, %p1422_p2 }
  0x2c   :  { %1430 = shalt.err (!%p1427_p4)
}
  0x2d   :  { %s1431_s5 = scalar_lea.vmem %s95_s17, 8192  ;;  %p1436_p6 = scmp.lt.s32.totalorder %s95_s17, %s95_s17 }
  0x2e   :  { %p1432_p5 = scmp.ne.s32.totalorder %s95_s17, %s1431_s5  ;;  %p1437_p7 = scmp.lt.s32.totalorder %s1431_s5, %s1431_s5 }
  0x30   :  { %p1438_p8 = por %p1437_p7, %p1436_p6 }
  0x32   :  { %p1439_p9 = pnand %p1438_p8, %p1432_p5 }
  0x34   :  { %1442 = shalt.err (!%p1439_p9)
}
  0x35   :  { %s1569_s23 = smov 256   ;;  %s1570_s14 = smov 16  }
  0x36   :  { %100 = dma.hbm_to_vmem [thread:$0]  %s1832_s9, 8192, %s95_s17, [#allocation12], %s1569_s23, %s1569_s23, %s1570_s14  }
  0x37   :  { %s1443_s20 = scalar_lea.hbm %s1823_s0, 128 }
  0x38   :  { %p1444_p10 = scmp.ne.s32.totalorder %s1823_s0, %s1443_s20  ;;  %p1447_p11 = scmp.lt.u32.totalorder %s1443_s20, %s1823_s0 }
  0x3a   :  { %p1449_p12 = pnand %p1447_p11, %p1444_p10 }
  0x3c   :  { %1452 = shalt.err (!%p1449_p12)
}
  0x3d   :  { %s1453_s28 = scalar_lea.vmem %s30_s21, 128  ;;  %p1458_p0 = scmp.lt.s32.totalorder %s30_s21, %s30_s21 }
  0x3e   :  { %p1454_p13 = scmp.ne.s32.totalorder %s30_s21, %s1453_s28  ;;  %p1459_p1 = scmp.lt.s32.totalorder %s1453_s28, %s1453_s28 }
  0x40   :  { %p1460_p2 = por %p1459_p1, %p1458_p0 }
  0x42   :  { %p1461_p3 = pnand %p1460_p2, %p1454_p13 }
  0x44   :  { %1464 = shalt.err (!%p1461_p3)
}
  0x45   :  { %32 = dma.hbm_to_vmem [thread:$0]  %s1823_s0, 128, %s30_s21, [#allocation3]  }
  0x46   :  { %s1571_s29 = smov [#allocation7]   ;;  %s1572_s5 = smov [#allocation10]  }
  0x47   :  { %s52_s30 = sshll.u32 %s1571_s29, 4  ;;  %s80_s15 = sshll.u32 %s1572_s5, 4  ;;  %s53_s30 = int_to_ptr.vmem [resolvable:$true] %s52_s30  ;;  %s1707_s15 = int_to_ptr.vmem [resolvable:$true] %s80_s15 }
  0x48   :  { %s1465_s16 = scalar_lea.hbm %s1826_s3, 1024 }
  0x49   :  { %p1466_p4 = scmp.ne.s32.totalorder %s1826_s3, %s1465_s16  ;;  %p1469_p5 = scmp.lt.u32.totalorder %s1465_s16, %s1826_s3 }
  0x4b   :  { %p1471_p6 = pnand %p1469_p5, %p1466_p4 }
  0x4d   :  { %1474 = shalt.err (!%p1471_p6)
}
  0x4e   :  { %s1475_s0 = scalar_lea.vmem %s53_s30, 1024  ;;  %p1480_p8 = scmp.lt.s32.totalorder %s53_s30, %s53_s30 }
  0x4f   :  { %p1476_p7 = scmp.ne.s32.totalorder %s53_s30, %s1475_s0  ;;  %p1481_p9 = scmp.lt.s32.totalorder %s1475_s0, %s1475_s0 }
  0x51   :  { %p1482_p10 = por %p1481_p9, %p1480_p8 }
  0x53   :  { %p1483_p11 = pnand %p1482_p10, %p1476_p7 }
  0x55   :  { %1486 = shalt.err (!%p1483_p11)
}
  0x56   :  { %58 = dma.hbm_to_vmem [thread:$0]  %s1826_s3, 1024, %s53_s30, [#allocation6], %s1564_s18, %s1564_s18, %s1565_s19  }
  0x57   :  { %s1487_s17 = scalar_lea.hbm %s1830_s7, 4096 }
  0x58   :  { %p1488_p12 = scmp.ne.s32.totalorder %s1830_s7, %s1487_s17  ;;  %p1491_p13 = scmp.lt.u32.totalorder %s1487_s17, %s1830_s7 }
  0x5a   :  { %p1493_p0 = pnand %p1491_p13, %p1488_p12 }
  0x5c   :  { %1496 = shalt.err (!%p1493_p0)
}
  0x5d   :  { %s1497_s16 = scalar_lea.vmem %s1707_s15, 4096  ;;  %p1502_p2 = scmp.lt.s32.totalorder %s1707_s15, %s1707_s15 }
  0x5e   :  { %p1498_p1 = scmp.ne.s32.totalorder %s1707_s15, %s1497_s16  ;;  %p1503_p3 = scmp.lt.s32.totalorder %s1497_s16, %s1497_s16 }
  0x60   :  { %p1504_p4 = por %p1503_p3, %p1502_p2 }
  0x62   :  { %p1505_p5 = pnand %p1504_p4, %p1498_p1 }
  0x64   :  { %1508 = shalt.err (!%p1505_p5)
}
  0x65   :  { %86 = dma.hbm_to_vmem [thread:$0]  %s1830_s7, 4096, %s1707_s15, [#allocation9], %s1569_s23, %s1569_s23, %s1570_s14  }
  0x66   :  { %s1573_s19 = smov [#allocation13]   ;;  %s1509_s24 = scalar_lea.hbm %s1834_s11, 16384 }
  0x67   :  { %s108_s30 = sshll.u32 %s1573_s19, 4  ;;  %p1510_p6 = scmp.ne.s32.totalorder %s1834_s11, %s1509_s24  ;;  %s109_s30 = int_to_ptr.vmem [resolvable:$true] %s108_s30 }
  0x68   :  { %p1513_p7 = scmp.lt.u32.totalorder %s1509_s24, %s1834_s11 }
  0x6a   :  { %p1515_p8 = pnand %p1513_p7, %p1510_p6 }
  0x6c   :  { %1518 = shalt.err (!%p1515_p8)
}
  0x6d   :  { %s1519_s28 = scalar_lea.vmem %s109_s30, 16384  ;;  %p1524_p10 = scmp.lt.s32.totalorder %s109_s30, %s109_s30 }
  0x6e   :  { %p1520_p9 = scmp.ne.s32.totalorder %s109_s30, %s1519_s28  ;;  %p1525_p11 = scmp.lt.s32.totalorder %s1519_s28, %s1519_s28 }
  0x70   :  { %p1526_p12 = por %p1525_p11, %p1524_p10 }
  0x72   :  { %p1527_p13 = pnand %p1526_p12, %p1520_p9 }
  0x74   :  { %1530 = shalt.err (!%p1527_p13)
}
  0x75   :  { %s1574_s7 = smov 512   ;;  %s1575_s23 = smov 32  }
  0x76   :  { %114 = dma.hbm_to_vmem [thread:$0]  %s1834_s11, 16384, %s109_s30, [#allocation12], %s1574_s7, %s1574_s7, %s1575_s23  }
  0x77   :  { %1553 = dma.done.wait [#allocation3], 128  }
  0x78   :  { %1554 = vsyncadd [#allocation3], 4294967168 }
  0x79   :  { %1555 = dma.done.wait [#allocation6], 1536  }
  0x7a   :  { %1556 = vsyncadd [#allocation6], 4294965760 }
  0x7b   :  { %1557 = dma.done.wait [#allocation9], 6144  }
  0x7c   :  { %1558 = vsyncadd [#allocation9], 4294961152 }
  0x7d   :  { %1559 = dma.done.wait [#allocation12], 24576  }
  0x7e   :  { %1560 = vsyncadd [#allocation12], 4294942720  ;;  %v1576_v0 = vmov 0.0|0.0   ;;  %vm1577_vm0 = vmmov 0   ;;  %v1578_v1 = vmov 0.0   ;;  %v139_v2 = vld [vmem:[#allocation5] sm:$0xff] }
  0x7f   :  { %1094 = vmatprep.subr.bf16.mxu0 %v1576_v0  ;;  %1037 = vmatprep.mubr.msk.f32.mxu0 %vm1577_vm0, %v1578_v1  ;;  %v140_v3 = vld [vmem:[#allocation5 + $0x8] sm:$0xff]  ;;  %v141_v4 = vld [vmem:[#allocation5 + $0x10] sm:$0xff]  ;;  %v142_v6 = vld [vmem:[#allocation5 + $0x18] sm:$0xff]  ;;  %vm150_vm1 = vcmask 261120   ;;  %vm240_vm2 = vcmask 523264  }
  0x80   :  { %1100 = vmatprep.subr.bf16.mxu1 %v1576_v0  ;;  %1056 = vmatprep.mubr.msk.f32.mxu1 %vm1577_vm0, %v1578_v1  ;;  %v1095_v5 = vpack.c.bf16 %v140_v3, %v139_v2  ;;  %v225_v7 = vld [vmem:[#allocation7] sm:$0xff]  ;;  %v226_v8 = vld [vmem:[#allocation7 + $0x8] sm:$0xff]  ;;  %v227_v9 = vld [vmem:[#allocation7 + $0x10] sm:$0xff]  ;;  %v1098_v11 = vpack.c.bf16 %v142_v6, %v141_v4 }
  0x81   :  { %v228_v10 = vld [vmem:[#allocation7 + $0x18] sm:$0xff]  ;;  %v1101_v12 = vpack.c.bf16 %v226_v8, %v225_v7  ;;  %v229_v14 = vld [vmem:[#allocation7 + $0x20] sm:$0xff]  ;;  %v230_v15 = vld [vmem:[#allocation7 + $0x28] sm:$0xff] }
  0x82   :  { %1096 = vmatpush3.bf16.msra.mxu0 %v1095_v5  ;;  %v1104_v13 = vpack.c.bf16 %v228_v10, %v227_v9  ;;  %v138_v16 = vld [vmem:[#allocation2] sm:$0xff]  ;;  %v1107_v17 = vpack.c.bf16 %v230_v15, %v229_v14  ;;  %v231_v18 = vld [vmem:[#allocation7 + $0x30] sm:$0xff]  ;;  %v315_v22 = vld [vmem:[#allocation8] sm:$0xff] }
  0x83   :  { %1097 = vmatprep.subr.bf16.mxu0 %v1576_v0  ;;  %1102 = vmatpush3.bf16.msra.mxu1 %v1101_v12  ;;  %v232_v19 = vld [vmem:[#allocation7 + $0x38] sm:$0xff]  ;;  %v316_v23 = vld [vmem:[#allocation8 + $0x8] sm:$0xff]  ;;  %v317_v29 = vld [vmem:[#allocation8 + $0x10] sm:$0xff] }
  0x84   :  { %1103 = vmatprep.subr.bf16.mxu1 %v1576_v0  ;;  %v1110_v20 = vpack.c.bf16 %v232_v19, %v231_v18  ;;  %v993_v21 = vld [vmem:[%s1825_s2] ss:$0 sm:$0xff]  ;;  %v1113_v27 = vpack.c.bf16 %v316_v23, %v315_v22  ;;  %v319_v32 = vld [vmem:[#allocation8 + $0x20] sm:$0xff]  ;;  %v320_v33 = vld [vmem:[#allocation8 + $0x28] sm:$0xff] }
  0x85   :  { %v318_v30 = vld [vmem:[#allocation8 + $0x18] sm:$0xff]  ;;  %v1119_v34 = vpack.c.bf16 %v320_v33, %v319_v32  ;;  %v321_v35 = vld [vmem:[#allocation8 + $0x30] sm:$0xff]  ;;  %v323_v38 = vld [vmem:[#allocation8 + $0x40] sm:$0xff] }
  0x86   :  { %1099 = vmatpush3.bf16.msra.mxu0 %v1098_v11  ;;  %v1116_v31 = vpack.c.bf16 %v318_v30, %v317_v29  ;;  %v322_v36 = vld [vmem:[#allocation8 + $0x38] sm:$0xff]  ;;  %v324_v39 = vld [vmem:[#allocation8 + $0x48] sm:$0xff]  ;;  %v325_v41 = vld [vmem:[#allocation8 + $0x50] sm:$0xff] }
  0x87   :  { %1105 = vmatpush3.bf16.msra.mxu1 %v1104_v13  ;;  %v1122_v37 = vpack.c.bf16 %v322_v36, %v321_v35  ;;  %v1125_v40 = vpack.c.bf16 %v324_v39, %v323_v38  ;;  %v326_v42 = vld [vmem:[#allocation8 + $0x58] sm:$0xff]  ;;  %v327_v44 = vld [vmem:[#allocation8 + $0x60] sm:$0xff]  ;;  %v328_v45 = vld [vmem:[#allocation8 + $0x68] sm:$0xff] }
  0x88   :  { %1106 = vmatprep.subr.bf16.mxu1 %v1576_v0  ;;  %v1128_v43 = vpack.c.bf16 %v326_v42, %v325_v41  ;;  %v1131_v46 = vpack.c.bf16 %v328_v45, %v327_v44  ;;  %v329_v47 = vld [vmem:[#allocation8 + $0x70] sm:$0xff]  ;;  %v330_v48 = vld [vmem:[#allocation8 + $0x78] sm:$0xff]  ;;  %v410_v50 = vld [vmem:[#allocation10 + $0x8] sm:$0xff] }
  0x89   :  { %1038 = vmatmul.mubr.msk.f32.vlgmr.msra.gmra.mrb[0].mxu0 %vm150_vm1, %v138_v16  ;;  %v1134_v49 = vpack.c.bf16 %v330_v48, %v329_v47  ;;  %v412_v51 = vld [vmem:[#allocation10 + $0x18] sm:$0xff]  ;;  %v409_v54 = vld [vmem:[#allocation10] sm:$0xff]  ;;  %v411_v55 = vld [vmem:[#allocation10 + $0x10] sm:$0xff] }
  0x8a   :  { %v1136_v52 = vpack.c.bf16 %v412_v51, %v410_v50  ;;  %v995_v53 = vld [vmem:[%s1827_s4] ss:$0 sm:$0xff]  ;;  %v414_v57 = vld [vmem:[#allocation10 + $0x28] sm:$0xff]  ;;  %v1138_v61 = vpack.c.bf16 %v411_v55, %v409_v54  ;;  %v415_v2 = vld [vmem:[#allocation10 + $0x30] sm:$0xff] }
  0x8b   :  { %1108 = vmatpush3.bf16.msra.mxu1 %v1107_v17  ;;  %v416_v58 = vld [vmem:[#allocation10 + $0x38] sm:$0xff]  ;;  %v418_v3 = vld [vmem:[#allocation10 + $0x48] sm:$0xff]  ;;  %v417_v7 = vld [vmem:[#allocation10 + $0x40] sm:$0xff] }
  0x8c   :  { %1109 = vmatprep.subr.bf16.mxu1 %v1576_v0  ;;  %v1140_v63 = vpack.c.bf16 %v416_v58, %v414_v57  ;;  %v420_v4 = vld [vmem:[#allocation10 + $0x58] sm:$0xff]  ;;  %v419_v8 = vld [vmem:[#allocation10 + $0x50] sm:$0xff]  ;;  %v422_v9 = vld [vmem:[#allocation10 + $0x68] sm:$0xff] }
  0x8d   :  { %v1144_v6 = vpack.c.bf16 %v420_v4, %v418_v3  ;;  %v424_v10 = vld [vmem:[#allocation10 + $0x78] sm:$0xff]  ;;  %v1146_v11 = vpack.c.bf16 %v419_v8, %v417_v7  ;;  %v421_v13 = vld [vmem:[#allocation10 + $0x60] sm:$0xff]  ;;  %v423_v14 = vld [vmem:[#allocation10 + $0x70] sm:$0xff] }
  0x8e   :  { %v1148_v12 = vpack.c.bf16 %v424_v10, %v422_v9  ;;  %v426_v15 = vld [vmem:[#allocation10 + $0x88] sm:$0xff]  ;;  %v428_v16 = vld [vmem:[#allocation10 + $0x98] sm:$0xff]  ;;  %v1150_v17 = vpack.c.bf16 %v423_v14, %v421_v13  ;;  %v425_v19 = vld [vmem:[#allocation10 + $0x80] sm:$0xff] }
  0x8f   :  { %1111 = vmatpush3.bf16.msra.mxu1 %v1110_v20  ;;  %v1152_v18 = vpack.c.bf16 %v428_v16, %v426_v15  ;;  %v430_v20 = vld [vmem:[#allocation10 + $0xa8] sm:$0xff]  ;;  %v433_v30 = vld [vmem:[#allocation10 + $0xc0] sm:$0xff]  ;;  %v533_v45 = vld [vmem:[#allocation11 + $0x38] sm:$0xff] }
  0x90   :  { %1112 = vmatprep.subr.bf16.mxu1 %v1576_v0  ;;  %v438_v33 = vld [vmem:[#allocation10 + $0xe8] sm:$0xff]  ;;  %v437_v36 = vld [vmem:[#allocation10 + $0xe0] sm:$0xff]  ;;  %v537_v51 = vld [vmem:[#allocation11 + $0x58] sm:$0xff] }
  0x91   :  { %v527_v39 = vld [vmem:[#allocation11 + $0x8] sm:$0xff]  ;;  %v526_v41 = vld [vmem:[#allocation11] sm:$0xff]  ;;  %v536_v55 = vld [vmem:[#allocation11 + $0x50] sm:$0xff] }
  0x92   :  { %v531_v44 = vld [vmem:[#allocation11 + $0x28] sm:$0xff]  ;;  %v530_v48 = vld [vmem:[#allocation11 + $0x20] sm:$0xff]  ;;  %v541_v57 = vld [vmem:[#allocation11 + $0x78] sm:$0xff] }
  0x93   :  { %v1172_v47 = vpack.c.bf16 %v533_v45, %v531_v44  ;;  %v535_v50 = vld [vmem:[#allocation11 + $0x48] sm:$0xff]  ;;  %v534_v54 = vld [vmem:[#allocation11 + $0x40] sm:$0xff]  ;;  %v544_v4 = vld [vmem:[#allocation11 + $0x90] sm:$0xff] }
  0x94   :  { %v1178_v58 = vpack.c.bf16 %v536_v55, %v534_v54  ;;  %v542_v3 = vld [vmem:[#allocation11 + $0x80] sm:$0xff]  ;;  %v548_v10 = vld [vmem:[#allocation11 + $0xb0] sm:$0xff] }
  0x95   :  { %v1186_v7 = vpack.c.bf16 %v544_v4, %v542_v3  ;;  %v546_v9 = vld [vmem:[#allocation11 + $0xa0] sm:$0xff]  ;;  %v552_v16 = vld [vmem:[#allocation11 + $0xd0] sm:$0xff] }
  0x96   :  { %v1190_v13 = vpack.c.bf16 %v548_v10, %v546_v9  ;;  %v550_v15 = vld [vmem:[#allocation11 + $0xc0] sm:$0xff]  ;;  %v572_v45 = vld [vmem:[#allocation11 + $0x170] sm:$0xff] }
  0x97   :  { %v570_v44 = vld [vmem:[#allocation11 + $0x160] sm:$0xff] }
  0x98   :  { %v582_v4 = vld [vmem:[#allocation11 + $0x1c0] sm:$0xff] }
  0x99   :  { %v586_v10 = vld [vmem:[#allocation11 + $0x1e0] sm:$0xff] }
 0x15c   :  { %v220_v24 = vpop.f32.mrb[0].mxu0 }
 0x15d   :  { %v221_v25 = vadd.f32 %v993_v21, %v220_v24  ;;  %v1039_v26 = vpop.f32.mrb[1].mxu0  ;;  %v432_v21 = vld [vmem:[#allocation10 + $0xb8] sm:$0xff]  ;;  %v429_v24 = vld [vmem:[#allocation10 + $0xa0] sm:$0xff] }
 0x15e   :  { %v1156_v23 = vpack.c.bf16 %v432_v21, %v430_v20  ;;  %v434_v26 = vld [vmem:[#allocation10 + $0xc8] sm:$0xff]  ;;  %v554_v20 = vld [vmem:[#allocation11 + $0xe0] sm:$0xff]  ;;  %v556_v21 = vld [vmem:[#allocation11 + $0xf0] sm:$0xff] }
 0x15f   :  { %v224_v28 = vmax.f32 %v221_v25, 0.0  ;;  %v431_v25 = vld [vmem:[#allocation10 + $0xb0] sm:$0xff] }
 0x161   :  { %1057 = vmatmul.mubr.msk.f32.vlgmr.msra.gmra.mrb[0].mxu1 %vm240_vm2, %v224_v28  ;;  %v1158_v28 = vpack.c.bf16 %v431_v25, %v429_v24  ;;  %v1198_v24 = vpack.c.bf16 %v556_v21, %v554_v20  ;;  %v684_v21 = vld [vmem:[#allocation13 + $0x48] sm:$0xff] }
 0x162   :  { %1114 = vmatpush3.bf16.msra.mxu1 %v1113_v27  ;;  %1091 = vmatprep.mubr.msk.f32.mxu1 %vm1577_vm0, %v1578_v1  ;;  %v436_v27 = vld [vmem:[#allocation10 + $0xd8] sm:$0xff] }
 0x163   :  { %1115 = vmatprep.subr.bf16.mxu1 %v1576_v0  ;;  %v1160_v29 = vpack.c.bf16 %v436_v27, %v434_v26  ;;  %v558_v26 = vld [vmem:[#allocation11 + $0x100] sm:$0xff]  ;;  %v560_v27 = vld [vmem:[#allocation11 + $0x110] sm:$0xff] }
 0x166   :  { %1117 = vmatpush3.bf16.msra.mxu1 %v1116_v31  ;;  %v435_v31 = vld [vmem:[#allocation10 + $0xd0] sm:$0xff] }
 0x167   :  { %1118 = vmatprep.subr.bf16.mxu1 %v1576_v0  ;;  %v1162_v32 = vpack.c.bf16 %v435_v31, %v433_v30  ;;  %v1202_v30 = vpack.c.bf16 %v560_v27, %v558_v26  ;;  %v692_v27 = vld [vmem:[#allocation13 + $0x88] sm:$0xff] }
 0x16a   :  { %1120 = vmatpush3.bf16.msra.mxu1 %v1119_v34  ;;  %v440_v34 = vld [vmem:[#allocation10 + $0xf8] sm:$0xff] }
 0x16b   :  { %1121 = vmatprep.subr.bf16.mxu1 %v1576_v0  ;;  %v1164_v35 = vpack.c.bf16 %v440_v34, %v438_v33  ;;  %v564_v33 = vld [vmem:[#allocation11 + $0x130] sm:$0xff]  ;;  %v567_v34 = vld [vmem:[#allocation11 + $0x148] sm:$0xff] }
 0x16e   :  { %1123 = vmatpush3.bf16.msra.mxu1 %v1122_v37  ;;  %v439_v37 = vld [vmem:[#allocation10 + $0xf0] sm:$0xff] }
 0x16f   :  { %1124 = vmatprep.subr.bf16.mxu1 %v1576_v0  ;;  %v1166_v38 = vpack.c.bf16 %v439_v37, %v437_v36 }
 0x172   :  { %1126 = vmatpush3.bf16.msra.mxu1 %v1125_v40  ;;  %v529_v40 = vld [vmem:[#allocation11 + $0x18] sm:$0xff] }
 0x173   :  { %1127 = vmatprep.subr.bf16.mxu1 %v1576_v0  ;;  %v1168_v42 = vpack.c.bf16 %v529_v40, %v527_v39  ;;  %v568_v39 = vld [vmem:[#allocation11 + $0x150] sm:$0xff]  ;;  %v571_v40 = vld [vmem:[#allocation11 + $0x168] sm:$0xff] }
 0x175   :  { %1169 = vmatprep.subr.bf16.mxu0 %v1168_v42 }
 0x176   :  { %1129 = vmatpush3.bf16.msra.mxu1 %v1128_v43  ;;  %v528_v43 = vld [vmem:[#allocation11 + $0x10] sm:$0xff] }
 0x177   :  { %1130 = vmatprep.subr.bf16.mxu1 %v1576_v0 }
 0x17a   :  { %1132 = vmatpush3.bf16.msra.mxu1 %v1131_v46  ;;  %v1170_v46 = vpack.c.bf16 %v528_v43, %v526_v41  ;;  %v573_v41 = vld [vmem:[#allocation11 + $0x178] sm:$0xff] }
 0x17b   :  { %1133 = vmatprep.subr.bf16.mxu1 %v1576_v0  ;;  %v413_v0 = vld [vmem:[#allocation10 + $0x20] sm:$0xff]  ;;  %v1212_v43 = vpack.c.bf16 %v573_v41, %v571_v40  ;;  %v712_v40 = vld [vmem:[#allocation13 + $0x128] sm:$0xff] }
 0x17c   :  { %v1142_v5 = vpack.c.bf16 %v415_v2, %v413_v0  ;;  %1171 = vmatpush1.bf16.msra.mxu0 %v1170_v46  ;;  %v575_v46 = vld [vmem:[#allocation11 + $0x188] sm:$0xff] }
 0x17d   :  { %1173 = vmatprep.subr.bf16.mxu0 %v1172_v47  ;;  %v577_v47 = vld [vmem:[#allocation11 + $0x198] sm:$0xff] }
 0x17e   :  { %1135 = vmatpush3.bf16.msra.mxu1 %v1134_v49  ;;  %v532_v49 = vld [vmem:[#allocation11 + $0x30] sm:$0xff] }
 0x17f   :  { %1137 = vmatprep.subr.bf16.mxu1 %v1136_v52  ;;  %v1174_v52 = vpack.c.bf16 %v532_v49, %v530_v48  ;;  %v1214_v48 = vpack.c.bf16 %v572_v45, %v570_v44  ;;  %v1216_v49 = vpack.c.bf16 %v577_v47, %v575_v46  ;;  %v716_v45 = vld [vmem:[#allocation13 + $0x148] sm:$0xff] }
 0x180   :  { %v720_v46 = vld [vmem:[#allocation13 + $0x168] sm:$0xff] }
 0x181   :  { %1175 = vmatpush1.bf16.msra.mxu0 %v1174_v52  ;;  %v579_v52 = vld [vmem:[#allocation11 + $0x1a8] sm:$0xff]  ;;  %v1252_v47 = vpack.c.bf16 %v720_v46, %v716_v45 }
 0x234   :  { %v310_v56 = vpop.f32.mrb[0].mxu1 }
 0x235   :  { %v311_v59 = vadd.f32 %v995_v53, %v310_v56  ;;  %v1058_v60 = vpop.f32.mrb[1].mxu1  ;;  %v1176_v53 = vpack.c.bf16 %v537_v51, %v535_v50  ;;  %v539_v56 = vld [vmem:[#allocation11 + $0x68] sm:$0xff]  ;;  %v574_v50 = vld [vmem:[#allocation11 + $0x180] sm:$0xff]  ;;  %v576_v51 = vld [vmem:[#allocation11 + $0x190] sm:$0xff] }
 0x236   :  { %v538_v60 = vld [vmem:[#allocation11 + $0x60] sm:$0xff]  ;;  %v1218_v54 = vpack.c.bf16 %v576_v51, %v574_v50  ;;  %v724_v51 = vld [vmem:[#allocation13 + $0x188] sm:$0xff] }
 0x237   :  { %v314_v62 = vmax.f32 %v311_v59, 0.0  ;;  %1177 = vmatprep.subr.bf16.mxu0 %v1176_v53  ;;  %v1180_v59 = vpack.c.bf16 %v541_v57, %v539_v56  ;;  %v581_v53 = vld [vmem:[#allocation11 + $0x1b8] sm:$0xff]  ;;  %v578_v56 = vld [vmem:[#allocation11 + $0x1a0] sm:$0xff]  ;;  %v580_v57 = vld [vmem:[#allocation11 + $0x1b0] sm:$0xff] }
 0x238   :  { %1179 = vmatpush1.bf16.msra.mxu0 %v1178_v58  ;;  %v1220_v55 = vpack.c.bf16 %v581_v53, %v579_v52  ;;  %v583_v58 = vld [vmem:[#allocation11 + $0x1c8] sm:$0xff] }
 0x239   :  { %1092 = vmatmul.mubr.f32.vlgmr.msra.gmra.mrb[2].mxu1 %v314_v62  ;;  %v543_v62 = vld [vmem:[#allocation11 + $0x88] sm:$0xff]  ;;  %1181 = vmatprep.subr.bf16.mxu0 %v1180_v59  ;;  %v585_v59 = vld [vmem:[#allocation11 + $0x1d8] sm:$0xff] }
 0x23a   :  { %1139 = vmatpush1.bf16.msra.mxu1 %v1138_v61  ;;  %517 = vmatprep.mubr.f32.mxu1 %v1578_v1  ;;  %v427_v1 = vld [vmem:[#allocation10 + $0x90] sm:$0xff]  ;;  %v728_v52 = vld [vmem:[#allocation13 + $0x1a8] sm:$0xff] }
 0x23b   :  { %1141 = vmatprep.subr.bf16.mxu1 %v1140_v63  ;;  %v1154_v22 = vpack.c.bf16 %v427_v1, %v425_v19  ;;  %v540_v61 = vld [vmem:[#allocation11 + $0x70] sm:$0xff]  ;;  %v545_v63 = vld [vmem:[#allocation11 + $0x98] sm:$0xff]  ;;  %v1194_v19 = vpack.c.bf16 %v552_v16, %v550_v15  ;;  %v1256_v53 = vpack.c.bf16 %v728_v52, %v724_v51 }
 0x23c   :  { %v1182_v0 = vpack.c.bf16 %v540_v61, %v538_v60  ;;  %v1184_v2 = vpack.c.bf16 %v545_v63, %v543_v62  ;;  %v1222_v60 = vpack.c.bf16 %v580_v57, %v578_v56  ;;  %v1224_v61 = vpack.c.bf16 %v585_v59, %v583_v58  ;;  %v997_v62 = vld [vmem:[%s1829_s6] ss:$0 sm:$0xff]  ;;  %v732_v57 = vld [vmem:[#allocation13 + $0x1c8] sm:$0xff] }
 0x23d   :  { %v678_v15 = vld [vmem:[#allocation13 + $0x18] sm:$0xff]  ;;  %v736_v58 = vld [vmem:[#allocation13 + $0x1e8] sm:$0xff] }
 0x23e   :  { %1143 = vmatpush1.bf16.msra.mxu1 %v1142_v5  ;;  %v547_v5 = vld [vmem:[#allocation11 + $0xa8] sm:$0xff]  ;;  %1183 = vmatpush1.bf16.msra.mxu0 %v1182_v0  ;;  %v1260_v59 = vpack.c.bf16 %v736_v58, %v732_v57  ;;  %v686_v51 = vld [vmem:[#allocation13 + $0x58] sm:$0xff]  ;;  %v685_v57 = vld [vmem:[#allocation13 + $0x50] sm:$0xff] }
 0x23f   :  { %1145 = vmatprep.subr.bf16.mxu1 %v1144_v6  ;;  %v549_v6 = vld [vmem:[#allocation11 + $0xb8] sm:$0xff]  ;;  %1185 = vmatprep.subr.bf16.mxu0 %v1184_v2  ;;  %v689_v58 = vld [vmem:[#allocation13 + $0x70] sm:$0xff] }
 0x240   :  { %v1188_v8 = vpack.c.bf16 %v549_v6, %v547_v5  ;;  %v584_v5 = vld [vmem:[#allocation11 + $0x1d0] sm:$0xff]  ;;  %v690_v52 = vld [vmem:[#allocation13 + $0x78] sm:$0xff] }
 0x241   :  { %v1226_v6 = vpack.c.bf16 %v584_v5, %v582_v4  ;;  %v743_v4 = vld [vmem:[#allocation13 + $0x220] sm:$0xff] }
 0x242   :  { %1147 = vmatpush1.bf16.msra.mxu1 %v1146_v11  ;;  %v551_v11 = vld [vmem:[#allocation11 + $0xc8] sm:$0xff]  ;;  %1187 = vmatpush1.bf16.msra.mxu0 %v1186_v7 }
 0x243   :  { %1149 = vmatprep.subr.bf16.mxu1 %v1148_v12  ;;  %v553_v12 = vld [vmem:[#allocation11 + $0xd8] sm:$0xff]  ;;  %1189 = vmatprep.subr.bf16.mxu0 %v1188_v8  ;;  %v587_v7 = vld [vmem:[#allocation11 + $0x1e8] sm:$0xff] }
 0x244   :  { %v1192_v14 = vpack.c.bf16 %v553_v12, %v551_v11  ;;  %v589_v8 = vld [vmem:[#allocation11 + $0x1f8] sm:$0xff]  ;;  %v588_v11 = vld [vmem:[#allocation11 + $0x1f0] sm:$0xff] }
 0x245   :  { %v1228_v9 = vpack.c.bf16 %v589_v8, %v587_v7  ;;  %v1230_v12 = vpack.c.bf16 %v588_v11, %v586_v10  ;;  %v752_v7 = vld [vmem:[#allocation13 + $0x268] sm:$0xff]  ;;  %v751_v10 = vld [vmem:[#allocation13 + $0x260] sm:$0xff] }
 0x246   :  { %1151 = vmatpush1.bf16.msra.mxu1 %v1150_v17  ;;  %v555_v17 = vld [vmem:[#allocation11 + $0xe8] sm:$0xff]  ;;  %1191 = vmatpush1.bf16.msra.mxu0 %v1190_v13 }
 0x247   :  { %1153 = vmatprep.subr.bf16.mxu1 %v1152_v18  ;;  %v557_v18 = vld [vmem:[#allocation11 + $0xf8] sm:$0xff]  ;;  %1193 = vmatprep.subr.bf16.mxu0 %v1192_v14  ;;  %v676_v13 = vld [vmem:[#allocation13 + $0x8] sm:$0xff] }
 0x248   :  { %v1196_v1 = vpack.c.bf16 %v557_v18, %v555_v17  ;;  %v680_v14 = vld [vmem:[#allocation13 + $0x28] sm:$0xff]  ;;  %v682_v17 = vld [vmem:[#allocation13 + $0x38] sm:$0xff]  ;;  %v675_v18 = vld [vmem:[#allocation13] sm:$0xff] }
 0x249   :  { %v1232_v16 = vpack.c.bf16 %v680_v14, %v676_v13  ;;  %v760_v13 = vld [vmem:[#allocation13 + $0x2a8] sm:$0xff] }
 0x24a   :  { %1155 = vmatpush1.bf16.msra.mxu1 %v1154_v22  ;;  %v559_v22 = vld [vmem:[#allocation11 + $0x108] sm:$0xff]  ;;  %1195 = vmatpush1.bf16.msra.mxu0 %v1194_v19  ;;  %v679_v19 = vld [vmem:[#allocation13 + $0x20] sm:$0xff] }
 0x24b   :  { %1157 = vmatprep.subr.bf16.mxu1 %v1156_v23  ;;  %v561_v23 = vld [vmem:[#allocation11 + $0x118] sm:$0xff]  ;;  %1197 = vmatprep.subr.bf16.mxu0 %v1196_v1  ;;  %v1296_v1 = vpack.c.bf16 %v682_v17, %v678_v15  ;;  %v1234_v20 = vpack.c.bf16 %v679_v19, %v675_v18  ;;  %v755_v15 = vld [vmem:[#allocation13 + $0x280] sm:$0xff]  ;;  %v764_v18 = vld [vmem:[#allocation13 + $0x2c8] sm:$0xff] }
 0x24c   :  { %v1200_v25 = vpack.c.bf16 %v561_v23, %v559_v22  ;;  %v688_v22 = vld [vmem:[#allocation13 + $0x68] sm:$0xff] }
 0x24d   :  { %v1236_v23 = vpack.c.bf16 %v688_v22, %v684_v21  ;;  %v768_v19 = vld [vmem:[#allocation13 + $0x2e8] sm:$0xff]  ;;  %v767_v21 = vld [vmem:[#allocation13 + $0x2e0] sm:$0xff] }
 0x24e   :  { %1159 = vmatpush1.bf16.msra.mxu1 %v1158_v28  ;;  %v563_v28 = vld [vmem:[#allocation11 + $0x128] sm:$0xff]  ;;  %1199 = vmatpush1.bf16.msra.mxu0 %v1198_v24  ;;  %v683_v24 = vld [vmem:[#allocation13 + $0x40] sm:$0xff] }
 0x24f   :  { %1161 = vmatprep.subr.bf16.mxu1 %v1160_v29  ;;  %v565_v29 = vld [vmem:[#allocation11 + $0x138] sm:$0xff]  ;;  %1201 = vmatprep.subr.bf16.mxu0 %v1200_v25  ;;  %v687_v25 = vld [vmem:[#allocation13 + $0x60] sm:$0xff] }
 0x250   :  { %v1204_v31 = vpack.c.bf16 %v565_v29, %v563_v28  ;;  %v1238_v26 = vpack.c.bf16 %v687_v25, %v683_v24  ;;  %v696_v28 = vld [vmem:[#allocation13 + $0xa8] sm:$0xff] }
 0x251   :  { %v1240_v29 = vpack.c.bf16 %v696_v28, %v692_v27  ;;  %v776_v24 = vld [vmem:[#allocation13 + $0x328] sm:$0xff]  ;;  %v775_v27 = vld [vmem:[#allocation13 + $0x320] sm:$0xff] }
 0x252   :  { %1163 = vmatpush1.bf16.msra.mxu1 %v1162_v32  ;;  %v562_v32 = vld [vmem:[#allocation11 + $0x120] sm:$0xff]  ;;  %1203 = vmatpush1.bf16.msra.mxu0 %v1202_v30 }
 0x253   :  { %1165 = vmatprep.subr.bf16.mxu1 %v1164_v35  ;;  %v569_v35 = vld [vmem:[#allocation11 + $0x158] sm:$0xff]  ;;  %v1206_v36 = vpack.c.bf16 %v564_v33, %v562_v32  ;;  %1205 = vmatprep.subr.bf16.mxu0 %v1204_v31  ;;  %v691_v30 = vld [vmem:[#allocation13 + $0x80] sm:$0xff]  ;;  %v700_v33 = vld [vmem:[#allocation13 + $0xc8] sm:$0xff] }
 0x254   :  { %v1208_v37 = vpack.c.bf16 %v569_v35, %v567_v34  ;;  %v695_v31 = vld [vmem:[#allocation13 + $0xa0] sm:$0xff]  ;;  %v704_v34 = vld [vmem:[#allocation13 + $0xe8] sm:$0xff] }
 0x255   :  { %v1242_v32 = vpack.c.bf16 %v695_v31, %v691_v30  ;;  %v1244_v35 = vpack.c.bf16 %v704_v34, %v700_v33  ;;  %v784_v30 = vld [vmem:[#allocation13 + $0x368] sm:$0xff]  ;;  %v783_v33 = vld [vmem:[#allocation13 + $0x360] sm:$0xff] }
 0x256   :  { %1167 = vmatpush1.bf16.msra.mxu1 %v1166_v38  ;;  %v566_v38 = vld [vmem:[#allocation11 + $0x140] sm:$0xff]  ;;  %1207 = vmatpush1.bf16.msra.mxu0 %v1206_v36 }
 0x257   :  { %v1210_v42 = vpack.c.bf16 %v568_v39, %v566_v38  ;;  %1209 = vmatprep.subr.bf16.mxu0 %v1208_v37  ;;  %1233 = vmatprep.subr.bf16.mxu1 %v1232_v16  ;;  %v699_v36 = vld [vmem:[#allocation13 + $0xc0] sm:$0xff]  ;;  %v708_v39 = vld [vmem:[#allocation13 + $0x108] sm:$0xff] }
 0x258   :  { %v703_v37 = vld [vmem:[#allocation13 + $0xe0] sm:$0xff]  ;;  %v1248_v41 = vpack.c.bf16 %v712_v40, %v708_v39 }
 0x259   :  { %v1246_v38 = vpack.c.bf16 %v703_v37, %v699_v36  ;;  %v759_v16 = vld [vmem:[#allocation13 + $0x2a0] sm:$0xff]  ;;  %v792_v36 = vld [vmem:[#allocation13 + $0x3a8] sm:$0xff] }
 0x25a   :  { %1211 = vmatpush1.bf16.msra.mxu0 %v1210_v42  ;;  %v707_v42 = vld [vmem:[#allocation13 + $0x100] sm:$0xff]  ;;  %v1274_v17 = vpack.c.bf16 %v759_v16, %v755_v15  ;;  %v722_v15 = vld [vmem:[#allocation13 + $0x178] sm:$0xff] }
 0x25b   :  { %1213 = vmatprep.subr.bf16.mxu0 %v1212_v43  ;;  %v711_v43 = vld [vmem:[#allocation13 + $0x120] sm:$0xff] }
 0x25c   :  { %v1250_v44 = vpack.c.bf16 %v711_v43, %v707_v42 }
 0x25e   :  { %1215 = vmatpush1.bf16.msra.mxu0 %v1214_v48  ;;  %v715_v48 = vld [vmem:[#allocation13 + $0x140] sm:$0xff] }
 0x25f   :  { %1217 = vmatprep.subr.bf16.mxu0 %v1216_v49  ;;  %v719_v49 = vld [vmem:[#allocation13 + $0x160] sm:$0xff] }
 0x260   :  { %v1254_v50 = vpack.c.bf16 %v719_v49, %v715_v48  ;;  %v677_v48 = vld [vmem:[#allocation13 + $0x10] sm:$0xff] }
 0x261   :  { %v681_v49 = vld [vmem:[#allocation13 + $0x30] sm:$0xff] }
 0x262   :  { %1219 = vmatpush1.bf16.msra.mxu0 %v1218_v54  ;;  %v723_v54 = vld [vmem:[#allocation13 + $0x180] sm:$0xff] }
 0x263   :  { %1221 = vmatprep.subr.bf16.mxu0 %v1220_v55  ;;  %v727_v55 = vld [vmem:[#allocation13 + $0x1a0] sm:$0xff] }
 0x264   :  { %v1258_v56 = vpack.c.bf16 %v727_v55, %v723_v54  ;;  %v1298_v54 = vpack.c.bf16 %v681_v49, %v677_v48 }
 0x266   :  { %1223 = vmatpush1.bf16.msra.mxu0 %v1222_v60  ;;  %v731_v60 = vld [vmem:[#allocation13 + $0x1c0] sm:$0xff] }
 0x267   :  { %1225 = vmatprep.subr.bf16.mxu0 %v1224_v61  ;;  %v735_v61 = vld [vmem:[#allocation13 + $0x1e0] sm:$0xff] }
 0x26a   :  { %1227 = vmatpush1.bf16.msra.mxu0 %v1226_v6  ;;  %v748_v6 = vld [vmem:[#allocation13 + $0x248] sm:$0xff] }
 0x26b   :  { %1229 = vmatprep.subr.bf16.mxu0 %v1228_v9  ;;  %v1268_v8 = vpack.c.bf16 %v752_v7, %v748_v6  ;;  %v747_v9 = vld [vmem:[#allocation13 + $0x240] sm:$0xff]  ;;  %v701_v6 = vld [vmem:[#allocation13 + $0xd0] sm:$0xff] }
 0x26c   :  { %v1270_v11 = vpack.c.bf16 %v751_v10, %v747_v9  ;;  %v705_v7 = vld [vmem:[#allocation13 + $0xf0] sm:$0xff]  ;;  %v714_v9 = vld [vmem:[#allocation13 + $0x138] sm:$0xff] }
 0x26d   :  { %v1310_v10 = vpack.c.bf16 %v705_v7, %v701_v6  ;;  %v785_v6 = vld [vmem:[#allocation13 + $0x370] sm:$0xff]  ;;  %v790_v7 = vld [vmem:[#allocation13 + $0x398] sm:$0xff] }
 0x26e   :  { %1231 = vmatpush1.bf16.msra.mxu0 %v1230_v12  ;;  %v756_v12 = vld [vmem:[#allocation13 + $0x288] sm:$0xff] }
 0x26f   :  { %1297 = vmatprep.subr.bf16.mxu0 %v1296_v1  ;;  %v1272_v14 = vpack.c.bf16 %v760_v13, %v756_v12  ;;  %v1276_v1 = vpack.c.bf16 %v768_v19, %v764_v18  ;;  %v709_v12 = vld [vmem:[#allocation13 + $0x110] sm:$0xff] }
 0x270   :  { %v713_v13 = vld [vmem:[#allocation13 + $0x130] sm:$0xff] }
 0x271   :  { %v1314_v16 = vpack.c.bf16 %v713_v13, %v709_v12  ;;  %v717_v18 = vld [vmem:[#allocation13 + $0x150] sm:$0xff]  ;;  %v791_v12 = vld [vmem:[#allocation13 + $0x3a0] sm:$0xff] }
 0x272   :  { %v721_v19 = vld [vmem:[#allocation13 + $0x170] sm:$0xff] }
 0x273   :  { %v789_v13 = vld [vmem:[#allocation13 + $0x390] sm:$0xff] }
 0x30c   :  { %v404_v63 = vpop.f32.mrb[2].mxu1 }
 0x30d   :  { %v405_v0 = vadd.f32 %v997_v62, %v404_v63  ;;  %v1093_v2 = vpop.f32.mrb[3].mxu1  ;;  %v1262_v62 = vpack.c.bf16 %v735_v61, %v731_v60  ;;  %v740_v63 = vld [vmem:[#allocation13 + $0x208] sm:$0xff]  ;;  %v698_v60 = vld [vmem:[#allocation13 + $0xb8] sm:$0xff]  ;;  %v1302_v61 = vpack.c.bf16 %v689_v58, %v685_v57  ;;  %v769_v57 = vld [vmem:[#allocation13 + $0x2f0] sm:$0xff] }
 0x30e   :  { %v774_v58 = vld [vmem:[#allocation13 + $0x318] sm:$0xff] }
 0x30f   :  { %v408_v3 = vmax.f32 %v405_v0, 0.0  ;;  %v744_v0 = vld [vmem:[#allocation13 + $0x228] sm:$0xff] }
 0x310   :  { %v1264_v2 = vpack.c.bf16 %v744_v0, %v740_v63  ;;  %v693_v63 = vld [vmem:[#allocation13 + $0x90] sm:$0xff] }
 0x311   :  { %518 = vmatmul.mubr.f32.vlgmr.msra.gmra.mrb[4].mxu1 %v408_v3  ;;  %v739_v3 = vld [vmem:[#allocation13 + $0x200] sm:$0xff]  ;;  %v697_v0 = vld [vmem:[#allocation13 + $0xb0] sm:$0xff] }
 0x312   :  { %1235 = vmatpush1.bf16.msra.mxu1 %v1234_v20  ;;  %v1266_v5 = vpack.c.bf16 %v743_v4, %v739_v3  ;;  %v763_v20 = vld [vmem:[#allocation13 + $0x2c0] sm:$0xff]  ;;  %v706_v3 = vld [vmem:[#allocation13 + $0xf8] sm:$0xff]  ;;  %v1306_v4 = vpack.c.bf16 %v697_v0, %v693_v63  ;;  %v777_v63 = vld [vmem:[#allocation13 + $0x330] sm:$0xff] }
 0x313   :  { %1237 = vmatprep.subr.bf16.mxu1 %v1236_v23  ;;  %v1278_v22 = vpack.c.bf16 %v767_v21, %v763_v20  ;;  %v772_v23 = vld [vmem:[#allocation13 + $0x308] sm:$0xff]  ;;  %v730_v20 = vld [vmem:[#allocation13 + $0x1b8] sm:$0xff]  ;;  %v1318_v21 = vpack.c.bf16 %v721_v19, %v717_v18 }
 0x314   :  { %v1280_v25 = vpack.c.bf16 %v776_v24, %v772_v23  ;;  %v725_v23 = vld [vmem:[#allocation13 + $0x190] sm:$0xff]  ;;  %v782_v0 = vld [vmem:[#allocation13 + $0x358] sm:$0xff]  ;;  %v800_v18 = vld [vmem:[#allocation13 + $0x3e8] sm:$0xff] }
 0x315   :  { %v729_v24 = vld [vmem:[#allocation13 + $0x1b0] sm:$0xff]  ;;  %v798_v19 = vld [vmem:[#allocation13 + $0x3d8] sm:$0xff] }
 0x316   :  { %1239 = vmatpush1.bf16.msra.mxu1 %v1238_v26  ;;  %v771_v26 = vld [vmem:[#allocation13 + $0x300] sm:$0xff] }
 0x317   :  { %1241 = vmatprep.subr.bf16.mxu1 %v1240_v29  ;;  %v1282_v28 = vpack.c.bf16 %v775_v27, %v771_v26  ;;  %v780_v29 = vld [vmem:[#allocation13 + $0x348] sm:$0xff]  ;;  %v738_v26 = vld [vmem:[#allocation13 + $0x1f8] sm:$0xff]  ;;  %v1322_v27 = vpack.c.bf16 %v729_v24, %v725_v23 }
 0x318   :  { %v1284_v31 = vpack.c.bf16 %v784_v30, %v780_v29  ;;  %v733_v29 = vld [vmem:[#allocation13 + $0x1d0] sm:$0xff] }
 0x319   :  { %v737_v30 = vld [vmem:[#allocation13 + $0x1f0] sm:$0xff] }
 0x31a   :  { %1243 = vmatpush1.bf16.msra.mxu1 %v1242_v32  ;;  %v779_v32 = vld [vmem:[#allocation13 + $0x340] sm:$0xff] }
 0x31b   :  { %1245 = vmatprep.subr.bf16.mxu1 %v1244_v35  ;;  %v1286_v34 = vpack.c.bf16 %v783_v33, %v779_v32  ;;  %v788_v35 = vld [vmem:[#allocation13 + $0x388] sm:$0xff]  ;;  %v746_v32 = vld [vmem:[#allocation13 + $0x238] sm:$0xff]  ;;  %v1326_v33 = vpack.c.bf16 %v737_v30, %v733_v29 }
 0x31c   :  { %v1288_v37 = vpack.c.bf16 %v792_v36, %v788_v35  ;;  %v741_v35 = vld [vmem:[#allocation13 + $0x210] sm:$0xff] }
 0x31d   :  { %v745_v36 = vld [vmem:[#allocation13 + $0x230] sm:$0xff] }
 0x31e   :  { %1247 = vmatpush1.bf16.msra.mxu1 %v1246_v38  ;;  %v443_v38 = vlaneseq }
 0x31f   :  { %1249 = vmatprep.subr.bf16.mxu1 %v1248_v41  ;;  %v441_v41 = vld [vmem:[%s1831_s8] sm:$0x3] }
 0x320   :  { %v1786_v39 = vshrl.u32 %v443_v38, 7  ;;  %v754_v38 = vld [vmem:[#allocation13 + $0x278] sm:$0xff] }
 0x322   :  { %1251 = vmatpush1.bf16.msra.mxu1 %v1250_v44  ;;  %v1789_v40 = vsub.s32 0, %v1786_v39  ;;  %v1795_v42 = vsub.s32 1, %v1786_v39 }
 0x323   :  { %1253 = vmatprep.subr.bf16.mxu1 %v1252_v47 }
 0x324   :  { %v446_v43 = vrot.slane %v441_v41, %v1789_v40  ;;  %v450_v44 = vrot.slane %v441_v41, %v1795_v42  ;;  %v1330_v41 = vpack.c.bf16 %v745_v36, %v741_v35 }
 0x326   :  { %1255 = vmatpush1.bf16.msra.mxu1 %v1254_v50 }
 0x327   :  { %1257 = vmatprep.subr.bf16.mxu1 %v1256_v53 }
 0x32a   :  { %1259 = vmatpush1.bf16.msra.mxu1 %v1258_v56  ;;  %v1300_v56 = vpack.c.bf16 %v690_v52, %v686_v51  ;;  %v761_v51 = vld [vmem:[#allocation13 + $0x2b0] sm:$0xff]  ;;  %v766_v52 = vld [vmem:[#allocation13 + $0x2d8] sm:$0xff] }
 0x32b   :  { %1261 = vmatprep.subr.bf16.mxu1 %v1260_v59  ;;  %v694_v59 = vld [vmem:[#allocation13 + $0x98] sm:$0xff] }
 0x32e   :  { %1263 = vmatpush1.bf16.msra.mxu1 %v1262_v62  ;;  %v1304_v62 = vpack.c.bf16 %v698_v60, %v694_v59  ;;  %v778_v59 = vld [vmem:[#allocation13 + $0x338] sm:$0xff] }
 0x32f   :  { %1265 = vmatprep.subr.bf16.mxu1 %v1264_v2  ;;  %v702_v2 = vld [vmem:[#allocation13 + $0xd8] sm:$0xff] }
 0x332   :  { %1267 = vmatpush1.bf16.msra.mxu1 %v1266_v5  ;;  %v1308_v5 = vpack.c.bf16 %v706_v3, %v702_v2  ;;  %v786_v2 = vld [vmem:[#allocation13 + $0x378] sm:$0xff] }
 0x333   :  { %1269 = vmatprep.subr.bf16.mxu1 %v1268_v8  ;;  %v710_v8 = vld [vmem:[#allocation13 + $0x118] sm:$0xff] }
 0x336   :  { %1271 = vmatpush1.bf16.msra.mxu1 %v1270_v11  ;;  %v1312_v11 = vpack.c.bf16 %v714_v9, %v710_v8  ;;  %v794_v8 = vld [vmem:[#allocation13 + $0x3b8] sm:$0xff] }
 0x337   :  { %1273 = vmatprep.subr.bf16.mxu1 %v1272_v14  ;;  %v718_v14 = vld [vmem:[#allocation13 + $0x158] sm:$0xff] }
 0x33a   :  { %1275 = vmatpush1.bf16.msra.mxu1 %v1274_v17  ;;  %v1316_v17 = vpack.c.bf16 %v722_v15, %v718_v14  ;;  %v793_v15 = vld [vmem:[#allocation13 + $0x3b0] sm:$0xff] }
 0x33b   :  { %1277 = vmatprep.subr.bf16.mxu1 %v1276_v1  ;;  %v726_v1 = vld [vmem:[#allocation13 + $0x198] sm:$0xff] }
 0x33e   :  { %1279 = vmatpush1.bf16.msra.mxu1 %v1278_v22  ;;  %v1320_v22 = vpack.c.bf16 %v730_v20, %v726_v1  ;;  %v802_v20 = vld [vmem:[#allocation13 + $0x3f8] sm:$0xff] }
 0x33f   :  { %1281 = vmatprep.subr.bf16.mxu1 %v1280_v25  ;;  %v734_v25 = vld [vmem:[#allocation13 + $0x1d8] sm:$0xff]  ;;  %v1356_v23 = vpack.c.bf16 %v802_v20, %v798_v19 }
 0x342   :  { %1283 = vmatpush1.bf16.msra.mxu1 %v1282_v28  ;;  %v1324_v28 = vpack.c.bf16 %v738_v26, %v734_v25  ;;  %v797_v25 = vld [vmem:[#allocation13 + $0x3d0] sm:$0xff] }
 0x343   :  { %1285 = vmatprep.subr.bf16.mxu1 %v1284_v31  ;;  %v742_v31 = vld [vmem:[#allocation13 + $0x218] sm:$0xff]  ;;  %v801_v26 = vld [vmem:[#allocation13 + $0x3f0] sm:$0xff] }
 0x346   :  { %1287 = vmatpush1.bf16.msra.mxu1 %v1286_v34  ;;  %v1328_v34 = vpack.c.bf16 %v746_v32, %v742_v31 }
 0x347   :  { %1289 = vmatprep.subr.bf16.mxu1 %v1288_v37  ;;  %v750_v37 = vld [vmem:[#allocation13 + $0x258] sm:$0xff] }
 0x3e4   :  { %v519_v45 = vpop.f32.mrb[4].mxu1 }
 0x3e5   :  { %v520_v46 = vadd.f32 %v519_v45, %v446_v43  ;;  %v521_v47 = vpop.f32.mrb[5].mxu1  ;;  %v1332_v43 = vpack.c.bf16 %v754_v38, %v750_v37  ;;  %v753_v45 = vld [vmem:[#allocation13 + $0x270] sm:$0xff]  ;;  %v815_v37 = vsub.s32 2, %v1786_v39  ;;  %v803_v38 = vld [vmem:[%s1835_s12] sm:$0xf] }
 0x3e6   :  { %v522_v50 = vadd.f32 %v521_v47, %v450_v44  ;;  %v749_v44 = vld [vmem:[#allocation13 + $0x250] sm:$0xff]  ;;  %v762_v47 = vld [vmem:[#allocation13 + $0x2b8] sm:$0xff] }
 0x3e7   :  { %v524_v55 = vmax.f32 %v520_v46, 0.0  ;;  %v758_v46 = vld [vmem:[#allocation13 + $0x298] sm:$0xff]  ;;  %v1334_v48 = vpack.c.bf16 %v753_v45, %v749_v44  ;;  %v816_v44 = vrot.slane %v803_v38, %v815_v37  ;;  %v812_v45 = vrot.slane %v803_v38, %v1795_v42 }
 0x3e8   :  { %v525_v53 = vmax.f32 %v522_v50, 0.0  ;;  %v1336_v49 = vpack.c.bf16 %v762_v47, %v758_v46  ;;  %v757_v50 = vld [vmem:[#allocation13 + $0x290] sm:$0xff] }
 0x3ea   :  { %666 = vmatprep.mubr.f32.mxu0 %v525_v53  ;;  %v770_v53 = vld [vmem:[#allocation13 + $0x2f8] sm:$0xff] }
 0x3eb   :  { %667 = vmatmul.mubr.f32.vlgmr.msra.gmra.mrb[2].mxu0 %v524_v55  ;;  %v1340_v55 = vpack.c.bf16 %v770_v53, %v766_v52 }
 0x3ec   :  { %1299 = vmatpush1.bf16.msra.mxu0 %v1298_v54  ;;  %v1338_v54 = vpack.c.bf16 %v761_v51, %v757_v50 }
 0x3ed   :  { %1301 = vmatprep.subr.bf16.mxu0 %v1300_v56  ;;  %v765_v56 = vld [vmem:[#allocation13 + $0x2d0] sm:$0xff] }
 0x3ee   :  { %v1342_v60 = vpack.c.bf16 %v769_v57, %v765_v56 }
 0x3f0   :  { %1303 = vmatpush1.bf16.msra.mxu0 %v1302_v61  ;;  %v1344_v61 = vpack.c.bf16 %v778_v59, %v774_v58 }
 0x3f1   :  { %1305 = vmatprep.subr.bf16.mxu0 %v1304_v62  ;;  %v773_v62 = vld [vmem:[#allocation13 + $0x310] sm:$0xff] }
 0x3f2   :  { %v1346_v3 = vpack.c.bf16 %v777_v63, %v773_v62 }
 0x3f4   :  { %1307 = vmatpush1.bf16.msra.mxu0 %v1306_v4  ;;  %v1348_v4 = vpack.c.bf16 %v786_v2, %v782_v0 }
 0x3f5   :  { %1309 = vmatprep.subr.bf16.mxu0 %v1308_v5  ;;  %v781_v5 = vld [vmem:[#allocation13 + $0x350] sm:$0xff] }
 0x3f6   :  { %v1350_v9 = vpack.c.bf16 %v785_v6, %v781_v5 }
 0x3f8   :  { %1311 = vmatpush1.bf16.msra.mxu0 %v1310_v10  ;;  %v1352_v10 = vpack.c.bf16 %v794_v8, %v790_v7 }
 0x3f9   :  { %1313 = vmatprep.subr.bf16.mxu0 %v1312_v11  ;;  %v787_v11 = vld [vmem:[#allocation13 + $0x380] sm:$0xff] }
 0x3fa   :  { %v1290_v14 = vpack.c.bf16 %v791_v12, %v787_v11 }
 0x3fc   :  { %1315 = vmatpush1.bf16.msra.mxu0 %v1314_v16  ;;  %v1354_v16 = vpack.c.bf16 %v793_v15, %v789_v13  ;;  %1291 = vmatpush1.bf16.msra.mxu1 %v1290_v14 }
 0x3fd   :  { %1317 = vmatprep.subr.bf16.mxu0 %v1316_v17  ;;  %v796_v17 = vld [vmem:[#allocation13 + $0x3c8] sm:$0xff] }
 0x3fe   :  { %v1292_v1 = vpack.c.bf16 %v800_v18, %v796_v17 }
 0x400   :  { %1319 = vmatpush1.bf16.msra.mxu0 %v1318_v21  ;;  %v795_v21 = vld [vmem:[#allocation13 + $0x3c0] sm:$0xff]  ;;  %1293 = vmatprep.subr.bf16.mxu1 %v1292_v1 }
 0x401   :  { %1321 = vmatprep.subr.bf16.mxu0 %v1320_v22  ;;  %v799_v22 = vld [vmem:[#allocation13 + $0x3e0] sm:$0xff] }
 0x402   :  { %v1294_v24 = vpack.c.bf16 %v799_v22, %v795_v21 }
 0x404   :  { %1323 = vmatpush1.bf16.msra.mxu0 %v1322_v27  ;;  %v1358_v27 = vpack.c.bf16 %v801_v26, %v797_v25  ;;  %1295 = vmatpush1.bf16.msra.mxu1 %v1294_v24 }
 0x405   :  { %1325 = vmatprep.subr.bf16.mxu0 %v1324_v28  ;;  %v590_v28 = vld [vmem:[%s1833_s10] sm:$0x3]  ;;  %s1579_s10 = smov [#allocation14]  }
 0x406   :  { %v595_v29 = vrot.slane %v590_v28, %v1789_v40  ;;  %v599_v30 = vrot.slane %v590_v28, %v1795_v42  ;;  %s981_s3 = sshll.u32 %s1579_s10, 4  ;;  %s982_s3 = int_to_ptr.vmem [resolvable:$true] %s981_s3 }
 0x407   :  { %s1531_s12 = scalar_lea.vmem %s982_s3, 512  ;;  %p1536_p1 = scmp.lt.s32.totalorder %s982_s3, %s982_s3 }
 0x408   :  { %1327 = vmatpush1.bf16.msra.mxu0 %v1326_v33  ;;  %p1532_p0 = scmp.ne.s32.totalorder %s982_s3, %s1531_s12  ;;  %p1537_p2 = scmp.lt.s32.totalorder %s1531_s12, %s1531_s12 }
 0x409   :  { %1329 = vmatprep.subr.bf16.mxu0 %v1328_v34 }
 0x40a   :  { %p1538_p3 = por %p1537_p2, %p1536_p1 }
 0x40c   :  { %1331 = vmatpush1.bf16.msra.mxu0 %v1330_v41  ;;  %v819_v41 = vsub.s32 3, %v1786_v39  ;;  %p1539_p4 = pnand %p1538_p3, %p1532_p0 }
 0x40d   :  { %1333 = vmatprep.subr.bf16.mxu0 %v1332_v43  ;;  %v808_v43 = vrot.slane %v803_v38, %v1789_v40 }
 0x40e   :  { %v820_v46 = vrot.slane %v803_v38, %v819_v41 }
 0x410   :  { %1335 = vmatpush1.bf16.msra.mxu0 %v1334_v48 }
 0x411   :  { %1337 = vmatprep.subr.bf16.mxu0 %v1336_v49 }
 0x414   :  { %1339 = vmatpush1.bf16.msra.mxu0 %v1338_v54 }
 0x415   :  { %1341 = vmatprep.subr.bf16.mxu0 %v1340_v55 }
 0x418   :  { %1343 = vmatpush1.bf16.msra.mxu0 %v1342_v60 }
 0x419   :  { %1345 = vmatprep.subr.bf16.mxu0 %v1344_v61 }
 0x41c   :  { %1347 = vmatpush1.bf16.msra.mxu0 %v1346_v3 }
 0x41d   :  { %1349 = vmatprep.subr.bf16.mxu0 %v1348_v4 }
 0x420   :  { %1351 = vmatpush1.bf16.msra.mxu0 %v1350_v9 }
 0x421   :  { %1353 = vmatprep.subr.bf16.mxu0 %v1352_v10 }
 0x424   :  { %1355 = vmatpush1.bf16.msra.mxu0 %v1354_v16 }
 0x425   :  { %1357 = vmatprep.subr.bf16.mxu0 %v1356_v23 }
 0x428   :  { %1359 = vmatpush1.bf16.msra.mxu0 %v1358_v27 }
 0x4be   :  { %v668_v31 = vpop.f32.mrb[2].mxu0 }
 0x4bf   :  { %v669_v32 = vadd.f32 %v668_v31, %v595_v29  ;;  %v670_v33 = vpop.f32.mrb[3].mxu0 }
 0x4c0   :  { %v671_v34 = vadd.f32 %v670_v33, %v599_v30 }
 0x4c1   :  { %v673_v36 = vmax.f32 %v669_v32, 0.0 }
 0x4c2   :  { %v674_v35 = vmax.f32 %v671_v34, 0.0 }
 0x4c4   :  { %889 = vmatprep.mubr.f32.mxu1 %v674_v35  ;;  %960 = vmatprep.mubr.f32.mxu0 %v674_v35 }
 0x4c5   :  { %890 = vmatmul.mubr.f32.vlgmr.msra.gmra.mrb[6].mxu1 %v673_v36  ;;  %961 = vmatmul.mubr.f32.vlgmr.msra.gmra.mrb[4].mxu0 %v673_v36 }
 0x598   :  { %v891_v47 = vpop.f32.mrb[6].mxu1  ;;  %v962_v48 = vpop.f32.mrb[4].mxu0 }
 0x599   :  { %v892_v49 = vadd.f32 %v891_v47, %v808_v43  ;;  %v963_v50 = vadd.f32 %v962_v48, %v816_v44  ;;  %v893_v51 = vpop.f32.mrb[7].mxu1  ;;  %v964_v52 = vpop.f32.mrb[5].mxu0 }
 0x59a   :  { %v894_v53 = vadd.f32 %v893_v51, %v812_v45  ;;  %v965_v54 = vadd.f32 %v964_v52, %v820_v46 }
 0x59b   :  { %v967_v55 = vmax.f32 %v892_v49, 0.0  ;;  %v969_v56 = vmax.f32 %v963_v50, 0.0 }
 0x59c   :  { %v968_v57 = vmax.f32 %v894_v53, 0.0  ;;  %v970_v39 = vmax.f32 %v965_v54, 0.0 }
 0x59d   :  { %971 = vst [vmem:[#allocation14] sm:$0xff] %v967_v55  ;;  %973 = vst [vmem:[#allocation14 + $0x10] sm:$0xff] %v969_v56 }
 0x59e   :  { %972 = vst [vmem:[#allocation14 + $0x8] sm:$0xff] %v968_v57  ;;  %974 = vst [vmem:[#allocation14 + $0x18] sm:$0xff] %v970_v39 }
 0x59f   :  { %1542 = shalt.err (!%p1539_p4)
}
 0x5a0   :  { %s1543_s30 = scalar_lea.hbm %s1836_s13, 512 }
 0x5a1   :  { %p1544_p5 = scmp.ne.s32.totalorder %s1836_s13, %s1543_s30  ;;  %p1547_p6 = scmp.lt.u32.totalorder %s1543_s30, %s1836_s13 }
 0x5a3   :  { %p1549_p7 = pnand %p1547_p6, %p1544_p5 }
 0x5a5   :  { %1552 = shalt.err (!%p1549_p7)
}
 0x5a6   :  { %984 = dma.vmem_to_hbm [thread:$0]  %s982_s3, 512, %s1836_s13, [#allocation4]  }
 0x5a7   :  { %1561 = dma.done.wait [#allocation4], 512  }
 0x5a8   :  { %1562 = vsyncadd [#allocation4], 4294966784 }
 0x5a9   :  { %988 = vsyncpa [#allocation3], 1 }
 0x5aa   :  { %989 = vsyncpa [#allocation6], 1 }
 0x5ab   :  { %990 = vsyncpa [#allocation9], 1 }
 0x5ac   :  { %991 = vsyncpa [#allocation12], 1 }
 0x5ad   :  { %992 = vsyncpa [#allocation4], 1 }

</bundles_post_ra>
